<compile_context>
chip_gen: v7x
topology: tpu7x:2x2x1
jax: 0.10.0
libtpu: 0.0.40
codegen_flags: <defaults>
</compile_context>

<pallas_src>
import functools
import math

import jax
import jax.numpy as jnp
from jax.experimental import pallas as pl
from jax.experimental.pallas import tpu as pltpu

# ----------------------------- configuration ------------------------------
B = 2              # batch
L = 8              # residues per complex
NUM_ATOMS = 5      # resolution 'backbone+CB' -> N, CA, C, O, CB
RES_FEAT = 32      # cfg.res_feat_dim
PAIR_FEAT = 16     # cfg.pair_feat_dim
NUM_HEADS = 4
HEAD_DIM = RES_FEAT // NUM_HEADS
MAX_AA = 22        # amino-acid vocabulary (incl. unknown/pad)
NUM_FRAG_TYPES = 10
RELPOS_CLIP = 32
RELPOS_DIM = 16
AAPAIR_DIM = 16
NUM_RBF = 16
NUM_STEPS = 100    # diffusion steps
POS_SCALE = 10.0

BB_N, BB_CA, BB_C = 0, 1, 2

RES_IN = RES_FEAT + NUM_ATOMS * 3 + 6 + RES_FEAT          # 85  residue-embed MLP input
PAIR_IN = RELPOS_DIM + AAPAIR_DIM + NUM_RBF               # 48  pair-embed MLP input
EPS_IN = RES_FEAT + MAX_AA + 3 + 3                        # 60  eps-net input projection

# lane padding for contraction dims (zero rows in the weights => numerically free)
RES_IN_PAD = 128
PAIR_IN_PAD = 128
EPS_IN_PAD = 128

HEAD_OUT = 3 + 3 + MAX_AA                                 # 28  eps | rot | seq logits
PAIR_OUT = PAIR_FEAT + NUM_HEADS                          # 20  pair feat | attn bias


# ----------------------------- kernel helpers ------------------------------
def _mxdot(a, w):
    """bf16 operands, f32 accumulation: MXU-native issue rate on v5e/v6e/v7x."""
    return jnp.dot(a.astype(jnp.bfloat16), w.astype(jnp.bfloat16),
                   preferred_element_type=jnp.float32)


# ----------------------------- Pallas kernels ------------------------------
def _mlp4_kernel(x_ref, w1, b1, w2, b2, w3, b3, w4, b4, o_ref):
    h = jnp.maximum(_mxdot(x_ref[...], w1[...]) + b1[...], 0.0)
    h = jnp.maximum(_mxdot(h, w2[...]) + b2[...], 0.0)
    h = jnp.maximum(_mxdot(h, w3[...]) + b3[...], 0.0)
    o_ref[...] = (_mxdot(h, w4[...]) + b4[...]).astype(o_ref.dtype)


def _eps_net_kernel(x_ref, bias_ref, w_in, b_in, w_qkv, b_qkv, w_o, b_o,
                    w_t1, b_t1, w_t2, b_t2, w_hd, b_hd, o_ref, attn_sc, *, scale):
    """Fused epsilon network: everything between the concatenated input features and
    the (eps, rot, seq) head outputs stays in VMEM / vregs."""
    F = RES_FEAT
    x = _mxdot(x_ref[...], w_in[...]) + b_in[...]                       # (B*L, F)
    qkv = _mxdot(x, w_qkv[...]) + b_qkv[...]                            # (B*L, 3F)

    # pair-biased multi-head attention; static (batch, head) unroll, slices of the
    # in-VMEM qkv activation (no HBM transposes). Tiny 8x8 dots stay in f32.
    for b in range(B):
        r0 = b * L
        for h in range(NUM_HEADS):
            c0 = h * HEAD_DIM
            q = qkv[r0:r0 + L, c0:c0 + HEAD_DIM]
            k = qkv[r0:r0 + L, F + c0:F + c0 + HEAD_DIM]
            v = qkv[r0:r0 + L, 2 * F + c0:2 * F + c0 + HEAD_DIM]
            logits = jnp.dot(q, k.T, preferred_element_type=jnp.float32) * scale \
                     + bias_ref[b, h]                                   # (L, L)
            m = jnp.max(logits, axis=-1, keepdims=True)
            p = jnp.exp(logits - m)
            p = p * pl.reciprocal(jnp.sum(p, axis=-1, keepdims=True), approx=True)
            attn_sc[r0:r0 + L, c0:c0 + HEAD_DIM] = jnp.dot(
                p, v, preferred_element_type=jnp.float32)

    x = x + _mxdot(attn_sc[...], w_o[...]) + b_o[...]
    # TODO(synk): real GAEncoder block also has LayerNorm and IPA geometric attention terms.
    h1 = jnp.maximum(_mxdot(x, w_t1[...]) + b_t1[...], 0.0)
    x = x + _mxdot(h1, w_t2[...]) + b_t2[...]
    o_ref[...] = (_mxdot(x, w_hd[...]) + b_hd[...]).astype(o_ref.dtype)  # (B*L, 28)


# ----------------------------- Pallas wrappers ------------------------------
def _full_spec(a):
    return pl.BlockSpec(a.shape, lambda i, _n=a.ndim: (0,) * _n)


def _full_out_spec(shape):
    n = len(shape)
    return pl.BlockSpec(shape, lambda i, _n=n: (0,) * _n)


def _row_tile(m):
    if m % 8 != 0:
        return m            # legal only because block == full array dim at toy sizes
    for t in (256, 128, 64, 32, 16, 8):
        if m % t == 0:
            return t
    return m


def pallas_mlp4(x, layers):
    (w1, b1), (w2, b2), (w3, b3), (w4, b4) = layers
    m, din = x.shape
    dout = w4.shape[1]
    tm = _row_tile(m)
    return pl.pallas_call(
        _mlp4_kernel,
        out_shape=jax.ShapeDtypeStruct((m, dout), jnp.float32),
        grid=(m // tm,),
        in_specs=[pl.BlockSpec((tm, din), lambda i: (i, 0)),
                  _full_spec(w1), _full_spec(b1),
                  _full_spec(w2), _full_spec(b2),
                  _full_spec(w3), _full_spec(b3),
                  _full_spec(w4), _full_spec(b4)],
        out_specs=pl.BlockSpec((tm, dout), lambda i: (i, 0)),
        compiler_params=pltpu.CompilerParams(dimension_semantics=("arbitrary",)),
    )(x, w1, b1, w2, b2, w3, b3, w4, b4)


def pallas_eps_net(x_in, bias, wb_list):
    args = [x_in, bias]
    for w, b in wb_list:
        args.extend([w, b])
    kern = functools.partial(_eps_net_kernel, scale=1.0 / math.sqrt(HEAD_DIM))
    return pl.pallas_call(
        kern,
        out_shape=jax.ShapeDtypeStruct((B * L, HEAD_OUT), jnp.float32),
        grid=(1,),
        in_specs=[_full_spec(a) for a in args],
        out_specs=_full_out_spec((B * L, HEAD_OUT)),
        scratch_shapes=[pltpu.VMEM((B * L, RES_FEAT), jnp.float32)],
        compiler_params=pltpu.CompilerParams(dimension_semantics=("arbitrary",)),
    )(*args)


# ----------------------------- geometry (JAX glue) ------------------------------
def construct_3d_basis(center, p1, p2):
    v1 = p1 - center
    e1 = v1 / (jnp.linalg.norm(v1, axis=-1, keepdims=True) + 1e-8)
    v2 = p2 - center
    u2 = v2 - jnp.sum(e1 * v2, axis=-1, keepdims=True) * e1
    e2 = u2 / (jnp.linalg.norm(u2, axis=-1, keepdims=True) + 1e-8)
    e3 = jnp.cross(e1, e2)
    return jnp.stack([e1, e2, e3], axis=-1)        # (B,L,3,3), columns are basis vecs


def rotation_to_so3vec(R):
    trace = R[..., 0, 0] + R[..., 1, 1] + R[..., 2, 2]
    cos = jnp.clip((trace - 1.0) / 2.0, -1.0 + 1e-6, 1.0 - 1e-6)
    angle = jnp.arccos(cos)
    axis = jnp.stack([R[..., 2, 1] - R[..., 1, 2],
                      R[..., 0, 2] - R[..., 2, 0],
                      R[..., 1, 0] - R[..., 0, 1]], axis=-1)
    axis = axis / (2.0 * jnp.sin(angle)[..., None] + 1e-8)
    return axis * angle[..., None]


def so3vec_to_rotation(v):
    theta = jnp.linalg.norm(v, axis=-1, keepdims=True)              # (B,L,1)
    axis = v / (theta + 1e-8)
    x, y, z = axis[..., 0], axis[..., 1], axis[..., 2]
    zero = jnp.zeros_like(x)
    K = jnp.stack([jnp.stack([zero, -z, y], axis=-1),
                   jnp.stack([z, zero, -x], axis=-1),
                   jnp.stack([-y, x, zero], axis=-1)], axis=-2)      # (B,L,3,3)
    s = jnp.sin(theta)[..., None]
    c = jnp.cos(theta)[..., None]
    eye = jnp.eye(3, dtype=v.dtype)
    return eye + s * K + (1.0 - c) * jnp.matmul(K, K)


# ----------------------------- parameters ------------------------------
def _dense(key, din, dout, din_pad=None):
    w = jax.random.normal(key, (din, dout), jnp.float32) / math.sqrt(din)
    if din_pad is not None and din_pad > din:
        w = jnp.concatenate([w, jnp.zeros((din_pad - din, dout), jnp.float32)], axis=0)
    b = jnp.zeros((1, dout), jnp.float32)
    return (w, b)


def init_params(key):
    ks = iter(jax.random.split(key, 48))
    p = {}
    p['aa_embed'] = 0.1 * jax.random.normal(next(ks), (MAX_AA, RES_FEAT), jnp.float32)
    p['type_embed'] = (0.1 * jax.random.normal(next(ks), (NUM_FRAG_TYPES, RES_FEAT),
                                               jnp.float32)).at[0].set(0.0)   # padding_idx=0
    p['relpos_embed'] = 0.1 * jax.random.normal(next(ks), (2 * RELPOS_CLIP + 1, RELPOS_DIM), jnp.float32)
    p['aapair_embed'] = 0.1 * jax.random.normal(next(ks), (MAX_AA * MAX_AA, AAPAIR_DIM), jnp.float32)
    p['res_mlp'] = [_dense(next(ks), RES_IN, 2 * RES_FEAT, din_pad=RES_IN_PAD),
                    _dense(next(ks), 2 * RES_FEAT, RES_FEAT),
                    _dense(next(ks), RES_FEAT, RES_FEAT),
                    _dense(next(ks), RES_FEAT, RES_FEAT)]
    p['pair_mlp'] = [_dense(next(ks), PAIR_IN, 2 * PAIR_FEAT, din_pad=PAIR_IN_PAD),
                     _dense(next(ks), 2 * PAIR_FEAT, PAIR_FEAT),
                     _dense(next(ks), PAIR_FEAT, PAIR_FEAT),
                     _dense(next(ks), PAIR_FEAT, PAIR_FEAT)]
    p['eps_in'] = _dense(next(ks), EPS_IN, RES_FEAT, din_pad=EPS_IN_PAD)
    p['pair_bias'] = _dense(next(ks), PAIR_FEAT, NUM_HEADS)
    wq, bq = _dense(next(ks), RES_FEAT, RES_FEAT)
    wk, bk = _dense(next(ks), RES_FEAT, RES_FEAT)
    wv, bv = _dense(next(ks), RES_FEAT, RES_FEAT)
    p['wqkv'] = (jnp.concatenate([wq, wk, wv], axis=1),
                 jnp.concatenate([bq, bk, bv], axis=1))               # fused (F, 3F)
    p['wo'] = _dense(next(ks), RES_FEAT, RES_FEAT)
    p['t1'] = _dense(next(ks), RES_FEAT, 2 * RES_FEAT)
    p['t2'] = _dense(next(ks), 2 * RES_FEAT, RES_FEAT)
    we, be = _dense(next(ks), RES_FEAT, 3)        # head_eps
    wr, br = _dense(next(ks), RES_FEAT, 3)        # head_rot
    ws, bs = _dense(next(ks), RES_FEAT, MAX_AA)   # head_seq
    p['heads'] = (jnp.concatenate([we, wr, ws], axis=1),
                  jnp.concatenate([be, br, bs], axis=1))              # fused (F, 28)
    betas = jnp.linspace(1e-4, 0.05, NUM_STEPS + 1).at[0].set(0.0)
    p['alpha_bars'] = jnp.cumprod(1.0 - betas)
    return p


def _pad_last(x, target):
    pad = target - x.shape[-1]
    if pad <= 0:
        return x
    return jnp.concatenate([x, jnp.zeros(x.shape[:-1] + (pad,), x.dtype)], axis=-1)


# ----------------------------- ResidueEmbedding ------------------------------
def residue_embed(p, batch, structure_mask, sequence_mask):
    aa = batch['aa']
    pos = batch['pos_heavyatom']
    mask_atoms = batch['mask_heavyatom']
    mask_res = mask_atoms[:, :, BB_CA]

    aa_in = aa if sequence_mask is None else jnp.where(sequence_mask, aa, MAX_AA - 1)
    aa_feat = jnp.take(p['aa_embed'], aa_in, axis=0)                          # (B,L,F)

    R = construct_3d_basis(pos[:, :, BB_CA], pos[:, :, BB_C], pos[:, :, BB_N])
    t = pos[:, :, BB_CA]
    crd = jnp.einsum('blik,blai->blak', R, pos - t[:, :, None, :])            # local coords
    crd = crd * mask_atoms[..., None].astype(jnp.float32)
    if structure_mask is not None:
        crd = crd * structure_mask[:, :, None, None].astype(jnp.float32)
    crd_feat = crd.reshape(B, L, NUM_ATOMS * 3)

    # TODO(synk): real model uses AngularEncoding of 3 backbone dihedrals; here only the
    # N-CA-C bond angle is angular-encoded.
    u = pos[:, :, BB_N] - pos[:, :, BB_CA]
    w = pos[:, :, BB_C] - pos[:, :, BB_CA]
    cosang = jnp.sum(u * w, -1) / (jnp.linalg.norm(u, axis=-1) * jnp.linalg.norm(w, axis=-1) + 1e-8)
    ang = jnp.arccos(jnp.clip(cosang, -1.0 + 1e-6, 1.0 - 1e-6))
    dihed_feat = jnp.concatenate(
        [jnp.stack([jnp.sin(k * ang), jnp.cos(k * ang)], axis=-1) for k in (1, 2, 3)], axis=-1)
    if structure_mask is not None:
        dihed_feat = dihed_feat * structure_mask[..., None].astype(jnp.float32)

    type_feat = jnp.take(p['type_embed'], batch['fragment_type'], axis=0)     # (B,L,F)

    feat = jnp.concatenate([aa_feat, crd_feat, dihed_feat, type_feat], axis=-1)
    feat = _pad_last(feat, RES_IN_PAD)                                        # lane-pad K to 128
    out = pallas_mlp4(feat.reshape(B * L, RES_IN_PAD), p['res_mlp']).reshape(B, L, RES_FEAT)
    return out * mask_res[..., None].astype(jnp.float32)


# ----------------------------- ResiduePairEncoder ------------------------------
def pair_embed(p, batch, structure_mask, sequence_mask):
    aa = batch['aa']
    res_nb = batch['res_nb']
    chain_nb = batch['chain_nb']
    pos = batch['pos_heavyatom']
    mask_atoms = batch['mask_heavyatom']
    mask_res = mask_atoms[:, :, BB_CA]
    mask2 = (mask_res[:, :, None] & mask_res[:, None, :]).astype(jnp.float32)

    d = jnp.clip(res_nb[:, :, None] - res_nb[:, None, :], -RELPOS_CLIP, RELPOS_CLIP) + RELPOS_CLIP
    same_chain = (chain_nb[:, :, None] == chain_nb[:, None, :]).astype(jnp.float32)
    relpos_feat = jnp.take(p['relpos_embed'], d, axis=0) * same_chain[..., None]

    aa_in = aa if sequence_mask is None else jnp.where(sequence_mask, aa, MAX_AA - 1)
    aapair_idx = aa_in[:, :, None] * MAX_AA + aa_in[:, None, :]
    aapair_feat = jnp.take(p['aapair_embed'], aapair_idx, axis=0)
    if sequence_mask is not None:
        sm2 = (sequence_mask[:, :, None] & sequence_mask[:, None, :]).astype(jnp.float32)
        aapair_feat = aapair_feat * sm2[..., None]

    # TODO(synk): real model uses all-atom pair distances with learnable per-aa-pair coefficients.
    ca = pos[:, :, BB_CA]
    dist = jnp.linalg.norm(ca[:, :, None, :] - ca[:, None, :, :], axis=-1)
    mu = jnp.linspace(0.0, 20.0, NUM_RBF)
    sigma = 20.0 / NUM_RBF
    rbf = jnp.exp(-((dist[..., None] - mu) / sigma) ** 2)
    if structure_mask is not None:
        st2 = (structure_mask[:, :, None] & structure_mask[:, None, :]).astype(jnp.float32)
        rbf = rbf * st2[..., None]

    feat = jnp.concatenate([relpos_feat, aapair_feat, rbf], axis=-1)           # (B,L,L,PAIR_IN)
    feat = _pad_last(feat, PAIR_IN_PAD)                                        # lane-pad K to 128

    # Fold the eps-net pair->attention-bias projection into the last MLP layer:
    # (mlp_out * mask2) @ Wb + bb == (cols 16:20 of the fused output) * mask2 + bb,
    # so one lane-dense 20-wide store replaces a second pallas launch with a 4-lane output.
    (w4, b4) = p['pair_mlp'][3]
    (wb, bb) = p['pair_bias']
    w4f = jnp.concatenate([w4, w4 @ wb], axis=1)                               # (16, 20)
    b4f = jnp.concatenate([b4, b4 @ wb], axis=1)                               # (1, 20)
    layers = [p['pair_mlp'][0], p['pair_mlp'][1], p['pair_mlp'][2], (w4f, b4f)]

    out = pallas_mlp4(feat.reshape(B * L * L, PAIR_IN_PAD), layers).reshape(B, L, L, PAIR_OUT)
    out = out * mask2[..., None]
    pair_feat = out[..., :PAIR_FEAT]                                           # (B,L,L,16)
    attn_bias = out[..., PAIR_FEAT:] + bb                                      # (B,L,L,H)
    return pair_feat, attn_bias


# ----------------------------- encode ------------------------------
def encode(p, batch, remove_structure, remove_sequence):
    structure_mask = (batch['mask_heavyatom'][:, :, BB_CA] & ~batch['mask_gen_pos']) if remove_structure else None
    sequence_mask = (batch['mask_heavyatom'][:, :, BB_CA] & ~batch['mask_gen_aa']) if remove_sequence else None
    res_feat = residue_embed(p, batch, structure_mask, sequence_mask)
    pair_feat, attn_bias = pair_embed(p, batch, structure_mask, sequence_mask)
    pos = batch['pos_heavyatom']
    R = construct_3d_basis(pos[:, :, BB_CA], pos[:, :, BB_C], pos[:, :, BB_N])
    t = pos[:, :, BB_CA]
    return res_feat, pair_feat, attn_bias, R, t


# ----------------------------- epsilon network ------------------------------
def eps_net(p, R_noisy, p_noisy, s_noisy, t, res_feat, attn_bias, mask_res):
    tt = t.astype(jnp.float32) / NUM_STEPS
    t_embed = jnp.stack([tt, jnp.sin(2.0 * jnp.pi * tt), jnp.cos(2.0 * jnp.pi * tt)], axis=-1)
    t_embed = jnp.broadcast_to(t_embed[:, None, :], (B, L, 3))
    s_onehot = jax.nn.one_hot(s_noisy, MAX_AA, dtype=jnp.float32)
    in_feat = jnp.concatenate([res_feat, s_onehot, t_embed, p_noisy], axis=-1)   # (B,L,EPS_IN)
    x_in = _pad_last(in_feat, EPS_IN_PAD).reshape(B * L, EPS_IN_PAD)

    # head-major layout + key mask, computed once in glue (tiny (B,H,L,L) tensor)
    bias = attn_bias.transpose(0, 3, 1, 2) + jnp.where(mask_res[:, None, None, :], 0.0, -1e9)

    out = pallas_eps_net(
        x_in, bias,
        [p['eps_in'], p['wqkv'], p['wo'], p['t1'], p['t2'], p['heads']])         # (B*L, 28)

    eps_local = out[:, 0:3].reshape(B, L, 3)
    v_pred = out[:, 3:6].reshape(B, L, 3)
    s_logits = out[:, 6:6 + MAX_AA].reshape(B, L, MAX_AA)
    eps_pos = jnp.einsum('blij,blj->bli', R_noisy, eps_local)                    # rotate to global
    return eps_pos, v_pred, s_logits


# ----------------------------- FullDPM forward (training losses) ------------------------------
def diffusion_forward(p, key, v_0, p_0, s_0, res_feat, pair_feat, attn_bias,
                      mask_gen_pos, mask_gen_aa, mask_res):
    # pair_feat's only consumer (the pair->bias projection) is already folded into attn_bias.
    del pair_feat
    kt, kp, kv, ks, kr = jax.random.split(key, 5)
    t = jax.random.randint(kt, (B,), 1, NUM_STEPS + 1)
    ab = p['alpha_bars'][t]                                                      # (B,)

    maskf = mask_res.astype(jnp.float32)[..., None]
    center = jnp.sum(p_0 * maskf, axis=1, keepdims=True) / (jnp.sum(maskf, axis=1, keepdims=True) + 1e-8)
    p0n = (p_0 - center) / POS_SCALE

    eps_p = jax.random.normal(kp, (B, L, 3), jnp.float32)
    p_noisy = jnp.sqrt(ab)[:, None, None] * p0n + jnp.sqrt(1.0 - ab)[:, None, None] * eps_p
    p_noisy = jnp.where(mask_gen_pos[..., None], p_noisy, p0n)

    # TODO(synk): IGSO(3) angular sampling approximated with Gaussian noise on the so(3) vector.
    v_noise = jax.random.normal(kv, (B, L, 3), jnp.float32)
    v_noisy = v_0 + jnp.sqrt(1.0 - ab)[:, None, None] * v_noise
    v_noisy = jnp.where(mask_gen_pos[..., None], v_noisy, v_0)
    R_noisy = so3vec_to_rotation(v_noisy)

    u = jax.random.uniform(ks, (B, L))
    rand_aa = jax.random.randint(kr, (B, L), 0, 20)
    s_noisy = jnp.where((u > ab[:, None]) & mask_gen_aa, rand_aa, s_0)

    eps_pred, v_pred, s_logits = eps_net(p, R_noisy, p_noisy, s_noisy, t,
                                         res_feat, attn_bias, mask_res)

    m_pos = (mask_gen_pos & mask_res).astype(jnp.float32)
    m_seq = (mask_gen_aa & mask_res).astype(jnp.float32)

    loss_pos = jnp.sum(jnp.mean((eps_pred - eps_p) ** 2, axis=-1) * m_pos) / (jnp.sum(m_pos) + 1e-8)
    # TODO(synk): real rotation loss is a rotation-matrix cosine loss on the denoised frame.
    loss_rot = jnp.sum(jnp.sum((v_pred - v_0) ** 2, axis=-1) * m_pos) / (jnp.sum(m_pos) + 1e-8)
    logp = jax.nn.log_softmax(s_logits, axis=-1)
    nll = -jnp.take_along_axis(logp, s_0[..., None], axis=-1)[..., 0]
    # TODO(synk): real sequence loss is a KL between multinomial-diffusion posteriors.
    loss_seq = jnp.sum(nll * m_seq) / (jnp.sum(m_seq) + 1e-8)
    return {'rot': loss_rot, 'pos': loss_pos, 'seq': loss_seq}


# ----------------------------- DiffusionPeptiDesign.forward ------------------------------
def diffpp_forward(p, batch, key):
    res_feat, pair_feat, attn_bias, R_0, p_0 = encode(
        p, batch, remove_structure=True, remove_sequence=True)
    v_0 = rotation_to_so3vec(R_0)
    s_0 = batch['aa']
    return diffusion_forward(p, key, v_0, p_0, s_0, res_feat, pair_feat, attn_bias,
                             batch['mask_gen_pos'], batch['mask_gen_aa'], batch['mask'])


# ----------------------------- example inputs ------------------------------
def make_batch(key):
    k1, k2, k3 = jax.random.split(key, 3)
    ca = jnp.cumsum(jnp.ones((B, L, 3), jnp.float32) * jnp.array([3.8, 0.0, 0.0]), axis=1)
    ca = ca + 0.5 * jax.random.normal(k1, (B, L, 3), jnp.float32)
    offsets = 1.2 * jax.random.normal(k2, (B, L, NUM_ATOMS, 3), jnp.float32)
    pos = ca[:, :, None, :] + offsets
    pos = pos.at[:, :, BB_CA, :].set(ca)
    aa = jax.random.randint(k3, (B, L), 0, 20)
    res_nb = jnp.broadcast_to(jnp.arange(1, L + 1, dtype=jnp.int32), (B, L))
    mask_gen = jnp.broadcast_to(jnp.arange(L) >= L // 2, (B, L))
    return {
        'aa': aa.astype(jnp.int32),
        'res_nb': res_nb,
        'chain_nb': mask_gen.astype(jnp.int32),
        'pos_heavyatom': pos.astype(jnp.float32),
        'mask_heavyatom': jnp.ones((B, L, NUM_ATOMS), jnp.bool_),
        'fragment_type': jnp.where(mask_gen, 2, 1).astype(jnp.int32),
        'mask': jnp.ones((B, L), jnp.bool_),
        'mask_gen_pos': mask_gen,
        'mask_gen_aa': mask_gen,
    }


if __name__ == "__main__":
    params = init_params(jax.random.PRNGKey(42))
    batch = make_batch(jax.random.PRNGKey(0))
    loss_dict = jax.jit(diffpp_forward)(params, batch, jax.random.PRNGKey(1))
    loss_dict = jax.block_until_ready(loss_dict)
    assert set(loss_dict.keys()) == {'rot', 'pos', 'seq'}
    assert all(bool(jnp.isfinite(v)) for v in loss_dict.values())
    print("KERNEL_OK")
</pallas_src>

<mosaic_0001>
module attributes {stable_mosaic.version = 11 : i64} {
  func.func @_mlp4_kernel(%arg0: i32, %arg1: memref<128x128xf32, #tpu.memory_space<vmem>>, %arg2: memref<128x32xf32, #tpu.memory_space<vmem>>, %arg3: memref<1x32xf32, #tpu.memory_space<vmem>>, %arg4: memref<32x16xf32, #tpu.memory_space<vmem>>, %arg5: memref<1x16xf32, #tpu.memory_space<vmem>>, %arg6: memref<16x16xf32, #tpu.memory_space<vmem>>, %arg7: memref<1x16xf32, #tpu.memory_space<vmem>>, %arg8: memref<16x20xf32, #tpu.memory_space<vmem>>, %arg9: memref<1x20xf32, #tpu.memory_space<vmem>>, %arg10: memref<128x20xf32, #tpu.memory_space<vmem>>) attributes {dimension_semantics = [#tpu.dimension_semantics<arbitrary>], iteration_bounds = array<i64: 1>, scalar_prefetch = 0 : i64, scratch_operands = 0 : i64, tpu.core_type = #tpu.core_type<tc>, window_params = [{transform_indices = @transform_0, window_bounds = array<i64: 128, 128>}, {pipeline_mode = #tpu.pipeline_mode<synchronous>, transform_indices = @transform_1, window_bounds = array<i64: 128, 32>}, {pipeline_mode = #tpu.pipeline_mode<synchronous>, transform_indices = @transform_2, window_bounds = array<i64: 1, 32>}, {pipeline_mode = #tpu.pipeline_mode<synchronous>, transform_indices = @transform_3, window_bounds = array<i64: 32, 16>}, {pipeline_mode = #tpu.pipeline_mode<synchronous>, transform_indices = @transform_4, window_bounds = array<i64: 1, 16>}, {pipeline_mode = #tpu.pipeline_mode<synchronous>, transform_indices = @transform_5, window_bounds = array<i64: 16, 16>}, {pipeline_mode = #tpu.pipeline_mode<synchronous>, transform_indices = @transform_6, window_bounds = array<i64: 1, 16>}, {pipeline_mode = #tpu.pipeline_mode<synchronous>, transform_indices = @transform_7, window_bounds = array<i64: 16, 20>}, {pipeline_mode = #tpu.pipeline_mode<synchronous>, transform_indices = @transform_8, window_bounds = array<i64: 1, 20>}, {transform_indices = @transform_9, window_bounds = array<i64: 128, 20>}]} {
    %c0 = arith.constant 0 : index
    %c0_0 = arith.constant 0 : index
    %0 = vector.load %arg1[%c0, %c0_0] : memref<128x128xf32, #tpu.memory_space<vmem>>, vector<128x128xf32>
    %c0_1 = arith.constant 0 : index
    %c0_2 = arith.constant 0 : index
    %1 = vector.load %arg2[%c0_1, %c0_2] : memref<128x32xf32, #tpu.memory_space<vmem>>, vector<128x32xf32>
    %2 = arith.truncf %0 : vector<128x128xf32> to vector<128x128xbf16>
    %3 = arith.truncf %1 : vector<128x32xf32> to vector<128x32xbf16>
    %cst = arith.constant dense<0.000000e+00> : vector<128x32xf32>
    %4 = tpu.matmul %2, %3, %cst {dimension_numbers = #tpu.dot_dimension_numbers<[1], [0], [0], [1], [0, 0, 1, 1], [], []>} : vector<128x128xbf16>, vector<128x32xbf16>, vector<128x32xf32> -> vector<128x32xf32>
    %c0_3 = arith.constant 0 : index
    %c0_4 = arith.constant 0 : index
    %5 = vector.load %arg3[%c0_3, %c0_4] : memref<1x32xf32, #tpu.memory_space<vmem>>, vector<1x32xf32>
    %6 = vector.broadcast %5 : vector<1x32xf32> to vector<128x32xf32>
    %7 = arith.addf %4, %6 : vector<128x32xf32>
    %cst_5 = arith.constant 0.000000e+00 : f32
    %8 = vector.broadcast %cst_5 : f32 to vector<128x32xf32>
    %9 = arith.maximumf %7, %8 : vector<128x32xf32>
    %c0_6 = arith.constant 0 : index
    %c0_7 = arith.constant 0 : index
    %10 = vector.load %arg4[%c0_6, %c0_7] : memref<32x16xf32, #tpu.memory_space<vmem>>, vector<32x16xf32>
    %11 = arith.truncf %9 : vector<128x32xf32> to vector<128x32xbf16>
    %12 = arith.truncf %10 : vector<32x16xf32> to vector<32x16xbf16>
    %cst_8 = arith.constant dense<0.000000e+00> : vector<128x16xf32>
    %13 = tpu.matmul %11, %12, %cst_8 {dimension_numbers = #tpu.dot_dimension_numbers<[1], [0], [0], [1], [0, 0, 1, 1], [], []>} : vector<128x32xbf16>, vector<32x16xbf16>, vector<128x16xf32> -> vector<128x16xf32>
    %c0_9 = arith.constant 0 : index
    %c0_10 = arith.constant 0 : index
    %14 = vector.load %arg5[%c0_9, %c0_10] : memref<1x16xf32, #tpu.memory_space<vmem>>, vector<1x16xf32>
    %15 = vector.broadcast %14 : vector<1x16xf32> to vector<128x16xf32>
    %16 = arith.addf %13, %15 : vector<128x16xf32>
    %cst_11 = arith.constant 0.000000e+00 : f32
    %17 = vector.broadcast %cst_11 : f32 to vector<128x16xf32>
    %18 = arith.maximumf %16, %17 : vector<128x16xf32>
    %c0_12 = arith.constant 0 : index
    %c0_13 = arith.constant 0 : index
    %19 = vector.load %arg6[%c0_12, %c0_13] : memref<16x16xf32, #tpu.memory_space<vmem>>, vector<16x16xf32>
    %20 = arith.truncf %18 : vector<128x16xf32> to vector<128x16xbf16>
    %21 = arith.truncf %19 : vector<16x16xf32> to vector<16x16xbf16>
    %cst_14 = arith.constant dense<0.000000e+00> : vector<128x16xf32>
    %22 = tpu.matmul %20, %21, %cst_14 {dimension_numbers = #tpu.dot_dimension_numbers<[1], [0], [0], [1], [0, 0, 1, 1], [], []>} : vector<128x16xbf16>, vector<16x16xbf16>, vector<128x16xf32> -> vector<128x16xf32>
    %c0_15 = arith.constant 0 : index
    %c0_16 = arith.constant 0 : index
    %23 = vector.load %arg7[%c0_15, %c0_16] : memref<1x16xf32, #tpu.memory_space<vmem>>, vector<1x16xf32>
    %24 = vector.broadcast %23 : vector<1x16xf32> to vector<128x16xf32>
    %25 = arith.addf %22, %24 : vector<128x16xf32>
    %cst_17 = arith.constant 0.000000e+00 : f32
    %26 = vector.broadcast %cst_17 : f32 to vector<128x16xf32>
    %27 = arith.maximumf %25, %26 : vector<128x16xf32>
    %c0_18 = arith.constant 0 : index
    %c0_19 = arith.constant 0 : index
    %28 = vector.load %arg8[%c0_18, %c0_19] : memref<16x20xf32, #tpu.memory_space<vmem>>, vector<16x20xf32>
    %29 = arith.truncf %27 : vector<128x16xf32> to vector<128x16xbf16>
    %30 = arith.truncf %28 : vector<16x20xf32> to vector<16x20xbf16>
    %cst_20 = arith.constant dense<0.000000e+00> : vector<128x20xf32>
    %31 = tpu.matmul %29, %30, %cst_20 {dimension_numbers = #tpu.dot_dimension_numbers<[1], [0], [0], [1], [0, 0, 1, 1], [], []>} : vector<128x16xbf16>, vector<16x20xbf16>, vector<128x20xf32> -> vector<128x20xf32>
    %c0_21 = arith.constant 0 : index
    %c0_22 = arith.constant 0 : index
    %32 = vector.load %arg9[%c0_21, %c0_22] : memref<1x20xf32, #tpu.memory_space<vmem>>, vector<1x20xf32>
    %33 = vector.broadcast %32 : vector<1x20xf32> to vector<128x20xf32>
    %34 = arith.addf %31, %33 : vector<128x20xf32>
    %c0_23 = arith.constant 0 : index
    %c0_24 = arith.constant 0 : index
    %35 = vector.load %arg10[%c0_23, %c0_24] : memref<128x20xf32, #tpu.memory_space<vmem>>, vector<128x20xf32>
    tpu.vector_store %arg10[%c0_23, %c0_24], %34 {strides = array<i32>} : memref<128x20xf32, #tpu.memory_space<vmem>>, vector<128x20xf32>,
    return
  }
  func.func @transform_0(%arg0: i32) -> (i32, i32) {
    %c0_i32 = arith.constant 0 : i32
    %c0_i32_0 = arith.constant 0 : i32
    return %arg0, %c0_i32 : i32, i32
  }
  func.func @transform_1(%arg0: i32) -> (i32, i32) {
    %c0_i32 = arith.constant 0 : i32
    %c0_i32_0 = arith.constant 0 : i32
    %c0_i32_1 = arith.constant 0 : i32
    return %c0_i32, %c0_i32_0 : i32, i32
  }
  func.func @transform_2(%arg0: i32) -> (i32, i32) {
    %c0_i32 = arith.constant 0 : i32
    %c0_i32_0 = arith.constant 0 : i32
    %c0_i32_1 = arith.constant 0 : i32
    return %c0_i32, %c0_i32_0 : i32, i32
  }
  func.func @transform_3(%arg0: i32) -> (i32, i32) {
    %c0_i32 = arith.constant 0 : i32
    %c0_i32_0 = arith.constant 0 : i32
    %c0_i32_1 = arith.constant 0 : i32
    return %c0_i32, %c0_i32_0 : i32, i32
  }
  func.func @transform_4(%arg0: i32) -> (i32, i32) {
    %c0_i32 = arith.constant 0 : i32
    %c0_i32_0 = arith.constant 0 : i32
    %c0_i32_1 = arith.constant 0 : i32
    return %c0_i32, %c0_i32_0 : i32, i32
  }
  func.func @transform_5(%arg0: i32) -> (i32, i32) {
    %c0_i32 = arith.constant 0 : i32
    %c0_i32_0 = arith.constant 0 : i32
    %c0_i32_1 = arith.constant 0 : i32
    return %c0_i32, %c0_i32_0 : i32, i32
  }
  func.func @transform_6(%arg0: i32) -> (i32, i32) {
    %c0_i32 = arith.constant 0 : i32
    %c0_i32_0 = arith.constant 0 : i32
    %c0_i32_1 = arith.constant 0 : i32
    return %c0_i32, %c0_i32_0 : i32, i32
  }
  func.func @transform_7(%arg0: i32) -> (i32, i32) {
    %c0_i32 = arith.constant 0 : i32
    %c0_i32_0 = arith.constant 0 : i32
    %c0_i32_1 = arith.constant 0 : i32
    return %c0_i32, %c0_i32_0 : i32, i32
  }
  func.func @transform_8(%arg0: i32) -> (i32, i32) {
    %c0_i32 = arith.constant 0 : i32
    %c0_i32_0 = arith.constant 0 : i32
    %c0_i32_1 = arith.constant 0 : i32
    return %c0_i32, %c0_i32_0 : i32, i32
  }
  func.func @transform_9(%arg0: i32) -> (i32, i32) {
    %c0_i32 = arith.constant 0 : i32
    %c0_i32_0 = arith.constant 0 : i32
    return %arg0, %c0_i32 : i32, i32
  }
}

module attributes {stable_mosaic.version = 11 : i64} {
  func.func @_mlp4_kernel(%arg0: i32, %arg1: memref<16x128xf32, #tpu.memory_space<vmem>>, %arg2: memref<128x64xf32, #tpu.memory_space<vmem>>, %arg3: memref<1x64xf32, #tpu.memory_space<vmem>>, %arg4: memref<64x32xf32, #tpu.memory_space<vmem>>, %arg5: memref<1x32xf32, #tpu.memory_space<vmem>>, %arg6: memref<32x32xf32, #tpu.memory_space<vmem>>, %arg7: memref<1x32xf32, #tpu.memory_space<vmem>>, %arg8: memref<32x32xf32, #tpu.memory_space<vmem>>, %arg9: memref<1x32xf32, #tpu.memory_space<vmem>>, %arg10: memref<16x32xf32, #tpu.memory_space<vmem>>) attributes {dimension_semantics = [#tpu.dimension_semantics<arbitrary>], iteration_bounds = array<i64: 1>, scalar_prefetch = 0 : i64, scratch_operands = 0 : i64, tpu.core_type = #tpu.core_type<tc>, window_params = [{transform_indices = @transform_0, window_bounds = array<i64: 16, 128>}, {pipeline_mode = #tpu.pipeline_mode<synchronous>, transform_indices = @transform_1, window_bounds = array<i64: 128, 64>}, {pipeline_mode = #tpu.pipeline_mode<synchronous>, transform_indices = @transform_2, window_bounds = array<i64: 1, 64>}, {pipeline_mode = #tpu.pipeline_mode<synchronous>, transform_indices = @transform_3, window_bounds = array<i64: 64, 32>}, {pipeline_mode = #tpu.pipeline_mode<synchronous>, transform_indices = @transform_4, window_bounds = array<i64: 1, 32>}, {pipeline_mode = #tpu.pipeline_mode<synchronous>, transform_indices = @transform_5, window_bounds = array<i64: 32, 32>}, {pipeline_mode = #tpu.pipeline_mode<synchronous>, transform_indices = @transform_6, window_bounds = array<i64: 1, 32>}, {pipeline_mode = #tpu.pipeline_mode<synchronous>, transform_indices = @transform_7, window_bounds = array<i64: 32, 32>}, {pipeline_mode = #tpu.pipeline_mode<synchronous>, transform_indices = @transform_8, window_bounds = array<i64: 1, 32>}, {transform_indices = @transform_9, window_bounds = array<i64: 16, 32>}]} {
    %c0 = arith.constant 0 : index
    %c0_0 = arith.constant 0 : index
    %0 = vector.load %arg1[%c0, %c0_0] : memref<16x128xf32, #tpu.memory_space<vmem>>, vector<16x128xf32>
    %c0_1 = arith.constant 0 : index
    %c0_2 = arith.constant 0 : index
    %1 = vector.load %arg2[%c0_1, %c0_2] : memref<128x64xf32, #tpu.memory_space<vmem>>, vector<128x64xf32>
    %2 = arith.truncf %0 : vector<16x128xf32> to vector<16x128xbf16>
    %3 = arith.truncf %1 : vector<128x64xf32> to vector<128x64xbf16>
    %cst = arith.constant dense<0.000000e+00> : vector<16x64xf32>
    %4 = tpu.matmul %2, %3, %cst {dimension_numbers = #tpu.dot_dimension_numbers<[1], [0], [0], [1], [0, 0, 1, 1], [], []>} : vector<16x128xbf16>, vector<128x64xbf16>, vector<16x64xf32> -> vector<16x64xf32>
    %c0_3 = arith.constant 0 : index
    %c0_4 = arith.constant 0 : index
    %5 = vector.load %arg3[%c0_3, %c0_4] : memref<1x64xf32, #tpu.memory_space<vmem>>, vector<1x64xf32>
    %6 = vector.broadcast %5 : vector<1x64xf32> to vector<16x64xf32>
    %7 = arith.addf %4, %6 : vector<16x64xf32>
    %cst_5 = arith.constant 0.000000e+00 : f32
    %8 = vector.broadcast %cst_5 : f32 to vector<16x64xf32>
    %9 = arith.maximumf %7, %8 : vector<16x64xf32>
    %c0_6 = arith.constant 0 : index
    %c0_7 = arith.constant 0 : index
    %10 = vector.load %arg4[%c0_6, %c0_7] : memref<64x32xf32, #tpu.memory_space<vmem>>, vector<64x32xf32>
    %11 = arith.truncf %9 : vector<16x64xf32> to vector<16x64xbf16>
    %12 = arith.truncf %10 : vector<64x32xf32> to vector<64x32xbf16>
    %cst_8 = arith.constant dense<0.000000e+00> : vector<16x32xf32>
    %13 = tpu.matmul %11, %12, %cst_8 {dimension_numbers = #tpu.dot_dimension_numbers<[1], [0], [0], [1], [0, 0, 1, 1], [], []>} : vector<16x64xbf16>, vector<64x32xbf16>, vector<16x32xf32> -> vector<16x32xf32>
    %c0_9 = arith.constant 0 : index
    %c0_10 = arith.constant 0 : index
    %14 = vector.load %arg5[%c0_9, %c0_10] : memref<1x32xf32, #tpu.memory_space<vmem>>, vector<1x32xf32>
    %15 = vector.broadcast %14 : vector<1x32xf32> to vector<16x32xf32>
    %16 = arith.addf %13, %15 : vector<16x32xf32>
    %cst_11 = arith.constant 0.000000e+00 : f32
    %17 = vector.broadcast %cst_11 : f32 to vector<16x32xf32>
    %18 = arith.maximumf %16, %17 : vector<16x32xf32>
    %c0_12 = arith.constant 0 : index
    %c0_13 = arith.constant 0 : index
    %19 = vector.load %arg6[%c0_12, %c0_13] : memref<32x32xf32, #tpu.memory_space<vmem>>, vector<32x32xf32>
    %20 = arith.truncf %18 : vector<16x32xf32> to vector<16x32xbf16>
    %21 = arith.truncf %19 : vector<32x32xf32> to vector<32x32xbf16>
    %cst_14 = arith.constant dense<0.000000e+00> : vector<16x32xf32>
    %22 = tpu.matmul %20, %21, %cst_14 {dimension_numbers = #tpu.dot_dimension_numbers<[1], [0], [0], [1], [0, 0, 1, 1], [], []>} : vector<16x32xbf16>, vector<32x32xbf16>, vector<16x32xf32> -> vector<16x32xf32>
    %c0_15 = arith.constant 0 : index
    %c0_16 = arith.constant 0 : index
    %23 = vector.load %arg7[%c0_15, %c0_16] : memref<1x32xf32, #tpu.memory_space<vmem>>, vector<1x32xf32>
    %24 = vector.broadcast %23 : vector<1x32xf32> to vector<16x32xf32>
    %25 = arith.addf %22, %24 : vector<16x32xf32>
    %cst_17 = arith.constant 0.000000e+00 : f32
    %26 = vector.broadcast %cst_17 : f32 to vector<16x32xf32>
    %27 = arith.maximumf %25, %26 : vector<16x32xf32>
    %c0_18 = arith.constant 0 : index
    %c0_19 = arith.constant 0 : index
    %28 = vector.load %arg8[%c0_18, %c0_19] : memref<32x32xf32, #tpu.memory_space<vmem>>, vector<32x32xf32>
    %29 = arith.truncf %27 : vector<16x32xf32> to vector<16x32xbf16>
    %30 = arith.truncf %28 : vector<32x32xf32> to vector<32x32xbf16>
    %cst_20 = arith.constant dense<0.000000e+00> : vector<16x32xf32>
    %31 = tpu.matmul %29, %30, %cst_20 {dimension_numbers = #tpu.dot_dimension_numbers<[1], [0], [0], [1], [0, 0, 1, 1], [], []>} : vector<16x32xbf16>, vector<32x32xbf16>, vector<16x32xf32> -> vector<16x32xf32>
    %c0_21 = arith.constant 0 : index
    %c0_22 = arith.constant 0 : index
    %32 = vector.load %arg9[%c0_21, %c0_22] : memref<1x32xf32, #tpu.memory_space<vmem>>, vector<1x32xf32>
    %33 = vector.broadcast %32 : vector<1x32xf32> to vector<16x32xf32>
    %34 = arith.addf %31, %33 : vector<16x32xf32>
    %c0_23 = arith.constant 0 : index
    %c0_24 = arith.constant 0 : index
    %35 = vector.load %arg10[%c0_23, %c0_24] : memref<16x32xf32, #tpu.memory_space<vmem>>, vector<16x32xf32>
    tpu.vector_store %arg10[%c0_23, %c0_24], %34 {strides = array<i32>} : memref<16x32xf32, #tpu.memory_space<vmem>>, vector<16x32xf32>,
    return
  }
  func.func @transform_0(%arg0: i32) -> (i32, i32) {
    %c0_i32 = arith.constant 0 : i32
    %c0_i32_0 = arith.constant 0 : i32
    return %arg0, %c0_i32 : i32, i32
  }
  func.func @transform_1(%arg0: i32) -> (i32, i32) {
    %c0_i32 = arith.constant 0 : i32
    %c0_i32_0 = arith.constant 0 : i32
    %c0_i32_1 = arith.constant 0 : i32
    return %c0_i32, %c0_i32_0 : i32, i32
  }
  func.func @transform_2(%arg0: i32) -> (i32, i32) {
    %c0_i32 = arith.constant 0 : i32
    %c0_i32_0 = arith.constant 0 : i32
    %c0_i32_1 = arith.constant 0 : i32
    return %c0_i32, %c0_i32_0 : i32, i32
  }
  func.func @transform_3(%arg0: i32) -> (i32, i32) {
    %c0_i32 = arith.constant 0 : i32
    %c0_i32_0 = arith.constant 0 : i32
    %c0_i32_1 = arith.constant 0 : i32
    return %c0_i32, %c0_i32_0 : i32, i32
  }
  func.func @transform_4(%arg0: i32) -> (i32, i32) {
    %c0_i32 = arith.constant 0 : i32
    %c0_i32_0 = arith.constant 0 : i32
    %c0_i32_1 = arith.constant 0 : i32
    return %c0_i32, %c0_i32_0 : i32, i32
  }
  func.func @transform_5(%arg0: i32) -> (i32, i32) {
    %c0_i32 = arith.constant 0 : i32
    %c0_i32_0 = arith.constant 0 : i32
    %c0_i32_1 = arith.constant 0 : i32
    return %c0_i32, %c0_i32_0 : i32, i32
  }
  func.func @transform_6(%arg0: i32) -> (i32, i32) {
    %c0_i32 = arith.constant 0 : i32
    %c0_i32_0 = arith.constant 0 : i32
    %c0_i32_1 = arith.constant 0 : i32
    return %c0_i32, %c0_i32_0 : i32, i32
  }
  func.func @transform_7(%arg0: i32) -> (i32, i32) {
    %c0_i32 = arith.constant 0 : i32
    %c0_i32_0 = arith.constant 0 : i32
    %c0_i32_1 = arith.constant 0 : i32
    return %c0_i32, %c0_i32_0 : i32, i32
  }
  func.func @transform_8(%arg0: i32) -> (i32, i32) {
    %c0_i32 = arith.constant 0 : i32
    %c0_i32_0 = arith.constant 0 : i32
    %c0_i32_1 = arith.constant 0 : i32
    return %c0_i32, %c0_i32_0 : i32, i32
  }
  func.func @transform_9(%arg0: i32) -> (i32, i32) {
    %c0_i32 = arith.constant 0 : i32
    %c0_i32_0 = arith.constant 0 : i32
    return %arg0, %c0_i32 : i32, i32
  }
}

module attributes {stable_mosaic.version = 11 : i64} {
  func.func @_eps_net_kernel(%arg0: i32, %arg1: memref<16x128xf32, #tpu.memory_space<vmem>>, %arg2: memref<2x4x8x8xf32, #tpu.memory_space<vmem>>, %arg3: memref<128x32xf32, #tpu.memory_space<vmem>>, %arg4: memref<1x32xf32, #tpu.memory_space<vmem>>, %arg5: memref<32x96xf32, #tpu.memory_space<vmem>>, %arg6: memref<1x96xf32, #tpu.memory_space<vmem>>, %arg7: memref<32x32xf32, #tpu.memory_space<vmem>>, %arg8: memref<1x32xf32, #tpu.memory_space<vmem>>, %arg9: memref<32x64xf32, #tpu.memory_space<vmem>>, %arg10: memref<1x64xf32, #tpu.memory_space<vmem>>, %arg11: memref<64x32xf32, #tpu.memory_space<vmem>>, %arg12: memref<1x32xf32, #tpu.memory_space<vmem>>, %arg13: memref<32x28xf32, #tpu.memory_space<vmem>>, %arg14: memref<1x28xf32, #tpu.memory_space<vmem>>, %arg15: memref<16x28xf32, #tpu.memory_space<vmem>>, %arg16: memref<16x32xf32, #tpu.memory_space<vmem>>) attributes {dimension_semantics = [#tpu.dimension_semantics<arbitrary>], iteration_bounds = array<i64: 1>, scalar_prefetch = 0 : i64, scratch_operands = 1 : i64, tpu.core_type = #tpu.core_type<tc>, window_params = [{pipeline_mode = #tpu.pipeline_mode<synchronous>, transform_indices = @transform_0, window_bounds = array<i64: 16, 128>}, {pipeline_mode = #tpu.pipeline_mode<synchronous>, transform_indices = @transform_1, window_bounds = array<i64: 2, 4, 8, 8>}, {pipeline_mode = #tpu.pipeline_mode<synchronous>, transform_indices = @transform_2, window_bounds = array<i64: 128, 32>}, {pipeline_mode = #tpu.pipeline_mode<synchronous>, transform_indices = @transform_3, window_bounds = array<i64: 1, 32>}, {pipeline_mode = #tpu.pipeline_mode<synchronous>, transform_indices = @transform_4, window_bounds = array<i64: 32, 96>}, {pipeline_mode = #tpu.pipeline_mode<synchronous>, transform_indices = @transform_5, window_bounds = array<i64: 1, 96>}, {pipeline_mode = #tpu.pipeline_mode<synchronous>, transform_indices = @transform_6, window_bounds = array<i64: 32, 32>}, {pipeline_mode = #tpu.pipeline_mode<synchronous>, transform_indices = @transform_7, window_bounds = array<i64: 1, 32>}, {pipeline_mode = #tpu.pipeline_mode<synchronous>, transform_indices = @transform_8, window_bounds = array<i64: 32, 64>}, {pipeline_mode = #tpu.pipeline_mode<synchronous>, transform_indices = @transform_9, window_bounds = array<i64: 1, 64>}, {pipeline_mode = #tpu.pipeline_mode<synchronous>, transform_indices = @transform_10, window_bounds = array<i64: 64, 32>}, {pipeline_mode = #tpu.pipeline_mode<synchronous>, transform_indices = @transform_11, window_bounds = array<i64: 1, 32>}, {pipeline_mode = #tpu.pipeline_mode<synchronous>, transform_indices = @transform_12, window_bounds = array<i64: 32, 28>}, {pipeline_mode = #tpu.pipeline_mode<synchronous>, transform_indices = @transform_13, window_bounds = array<i64: 1, 28>}, {pipeline_mode = #tpu.pipeline_mode<synchronous>, transform_indices = @transform_14, window_bounds = array<i64: 16, 28>}]} {
    %c0 = arith.constant 0 : index
    %c0_0 = arith.constant 0 : index
    %0 = vector.load %arg1[%c0, %c0_0] : memref<16x128xf32, #tpu.memory_space<vmem>>, vector<16x128xf32>
    %c0_1 = arith.constant 0 : index
    %c0_2 = arith.constant 0 : index
    %1 = vector.load %arg3[%c0_1, %c0_2] : memref<128x32xf32, #tpu.memory_space<vmem>>, vector<128x32xf32>
    %2 = arith.truncf %0 : vector<16x128xf32> to vector<16x128xbf16>
    %3 = arith.truncf %1 : vector<128x32xf32> to vector<128x32xbf16>
    %cst = arith.constant dense<0.000000e+00> : vector<16x32xf32>
    %4 = tpu.matmul %2, %3, %cst {dimension_numbers = #tpu.dot_dimension_numbers<[1], [0], [0], [1], [0, 0, 1, 1], [], []>} : vector<16x128xbf16>, vector<128x32xbf16>, vector<16x32xf32> -> vector<16x32xf32>
    %c0_3 = arith.constant 0 : index
    %c0_4 = arith.constant 0 : index
    %5 = vector.load %arg4[%c0_3, %c0_4] : memref<1x32xf32, #tpu.memory_space<vmem>>, vector<1x32xf32>
    %6 = vector.broadcast %5 : vector<1x32xf32> to vector<16x32xf32>
    %7 = arith.addf %4, %6 : vector<16x32xf32>
    %c0_5 = arith.constant 0 : index
    %c0_6 = arith.constant 0 : index
    %8 = vector.load %arg5[%c0_5, %c0_6] : memref<32x96xf32, #tpu.memory_space<vmem>>, vector<32x96xf32>
    %9 = arith.truncf %7 : vector<16x32xf32> to vector<16x32xbf16>
    %10 = arith.truncf %8 : vector<32x96xf32> to vector<32x96xbf16>
    %cst_7 = arith.constant dense<0.000000e+00> : vector<16x96xf32>
    %11 = tpu.matmul %9, %10, %cst_7 {dimension_numbers = #tpu.dot_dimension_numbers<[1], [0], [0], [1], [0, 0, 1, 1], [], []>} : vector<16x32xbf16>, vector<32x96xbf16>, vector<16x96xf32> -> vector<16x96xf32>
    %c0_8 = arith.constant 0 : index
    %c0_9 = arith.constant 0 : index
    %12 = vector.load %arg6[%c0_8, %c0_9] : memref<1x96xf32, #tpu.memory_space<vmem>>, vector<1x96xf32>
    %13 = vector.broadcast %12 : vector<1x96xf32> to vector<16x96xf32>
    %14 = arith.addf %11, %13 : vector<16x96xf32>
    %15 = vector.extract_strided_slice %14 {offsets = [0, 0], sizes = [8, 8], strides = [1, 1]} : vector<16x96xf32> to vector<8x8xf32>
    %16 = vector.extract_strided_slice %14 {offsets = [0, 32], sizes = [8, 8], strides = [1, 1]} : vector<16x96xf32> to vector<8x8xf32>
    %17 = vector.extract_strided_slice %14 {offsets = [0, 64], sizes = [8, 8], strides = [1, 1]} : vector<16x96xf32> to vector<8x8xf32>
    %18 = tpu.transpose %16, [1, 0] : vector<8x8xf32> -> vector<8x8xf32>
    %cst_10 = arith.constant dense<0.000000e+00> : vector<8x8xf32>
    %19 = tpu.matmul %15, %18, %cst_10 {dimension_numbers = #tpu.dot_dimension_numbers<[1], [0], [0], [1], [0, 0, 1, 1], [], []>} : vector<8x8xf32>, vector<8x8xf32>, vector<8x8xf32> -> vector<8x8xf32>
    %cst_11 = arith.constant 0.353553385 : f32
    %20 = vector.broadcast %cst_11 : f32 to vector<8x8xf32>
    %21 = arith.mulf %19, %20 : vector<8x8xf32>
    %c0_12 = arith.constant 0 : index
    %c0_13 = arith.constant 0 : index
    %c0_14 = arith.constant 0 : index
    %c0_15 = arith.constant 0 : index
    %22 = vector.load %arg2[%c0_12, %c0_13, %c0_14, %c0_15] : memref<2x4x8x8xf32, #tpu.memory_space<vmem>>, vector<1x1x8x8xf32>
    %23 = vector.shape_cast %22 : vector<1x1x8x8xf32> to vector<8x8xf32>
    %24 = arith.addf %21, %23 : vector<8x8xf32>
    %cst_16 = arith.constant dense<0xFF800000> : vector<8xf32>
    %25 = vector.multi_reduction <maximumf>, %24, %cst_16 [1] : vector<8x8xf32> to vector<8xf32>
    %26 = vector.shape_cast %25 : vector<8xf32> to vector<8x1xf32>
    %27 = vector.broadcast %26 : vector<8x1xf32> to vector<8x8xf32>
    %28 = arith.subf %24, %27 : vector<8x8xf32>
    %29 = math.exp %28 : vector<8x8xf32>
    %cst_17 = arith.constant dense<0.000000e+00> : vector<8xf32>
    %30 = vector.multi_reduction <add>, %29, %cst_17 [1] : vector<8x8xf32> to vector<8xf32>
    %31 = vector.shape_cast %30 : vector<8xf32> to vector<8x1xf32>
    %32 = tpu.reciprocal %31 {approx = true} : vector<8x1xf32> -> vector<8x1xf32>
    %33 = vector.broadcast %32 : vector<8x1xf32> to vector<8x8xf32>
    %34 = arith.mulf %29, %33 : vector<8x8xf32>
    %cst_18 = arith.constant dense<0.000000e+00> : vector<8x8xf32>
    %35 = tpu.matmul %34, %17, %cst_18 {dimension_numbers = #tpu.dot_dimension_numbers<[1], [0], [0], [1], [0, 0, 1, 1], [], []>} : vector<8x8xf32>, vector<8x8xf32>, vector<8x8xf32> -> vector<8x8xf32>
    %c0_19 = arith.constant 0 : index
    %c0_20 = arith.constant 0 : index
    %36 = vector.load %arg16[%c0_19, %c0_20] : memref<16x32xf32, #tpu.memory_space<vmem>>, vector<8x8xf32>
    tpu.vector_store %arg16[%c0_19, %c0_20], %35 {strides = array<i32>} : memref<16x32xf32, #tpu.memory_space<vmem>>, vector<8x8xf32>,
    %37 = vector.extract_strided_slice %14 {offsets = [0, 8], sizes = [8, 8], strides = [1, 1]} : vector<16x96xf32> to vector<8x8xf32>
    %38 = vector.extract_strided_slice %14 {offsets = [0, 40], sizes = [8, 8], strides = [1, 1]} : vector<16x96xf32> to vector<8x8xf32>
    %39 = vector.extract_strided_slice %14 {offsets = [0, 72], sizes = [8, 8], strides = [1, 1]} : vector<16x96xf32> to vector<8x8xf32>
    %40 = tpu.transpose %38, [1, 0] : vector<8x8xf32> -> vector<8x8xf32>
    %cst_21 = arith.constant dense<0.000000e+00> : vector<8x8xf32>
    %41 = tpu.matmul %37, %40, %cst_21 {dimension_numbers = #tpu.dot_dimension_numbers<[1], [0], [0], [1], [0, 0, 1, 1], [], []>} : vector<8x8xf32>, vector<8x8xf32>, vector<8x8xf32> -> vector<8x8xf32>
    %cst_22 = arith.constant 0.353553385 : f32
    %42 = vector.broadcast %cst_22 : f32 to vector<8x8xf32>
    %43 = arith.mulf %41, %42 : vector<8x8xf32>
    %c0_23 = arith.constant 0 : index
    %c1 = arith.constant 1 : index
    %c0_24 = arith.constant 0 : index
    %c0_25 = arith.constant 0 : index
    %44 = vector.load %arg2[%c0_23, %c1, %c0_24, %c0_25] : memref<2x4x8x8xf32, #tpu.memory_space<vmem>>, vector<1x1x8x8xf32>
    %45 = vector.shape_cast %44 : vector<1x1x8x8xf32> to vector<8x8xf32>
    %46 = arith.addf %43, %45 : vector<8x8xf32>
    %cst_26 = arith.constant dense<0xFF800000> : vector<8xf32>
    %47 = vector.multi_reduction <maximumf>, %46, %cst_26 [1] : vector<8x8xf32> to vector<8xf32>
    %48 = vector.shape_cast %47 : vector<8xf32> to vector<8x1xf32>
    %49 = vector.broadcast %48 : vector<8x1xf32> to vector<8x8xf32>
    %50 = arith.subf %46, %49 : vector<8x8xf32>
    %51 = math.exp %50 : vector<8x8xf32>
    %cst_27 = arith.constant dense<0.000000e+00> : vector<8xf32>
    %52 = vector.multi_reduction <add>, %51, %cst_27 [1] : vector<8x8xf32> to vector<8xf32>
    %53 = vector.shape_cast %52 : vector<8xf32> to vector<8x1xf32>
    %54 = tpu.reciprocal %53 {approx = true} : vector<8x1xf32> -> vector<8x1xf32>
    %55 = vector.broadcast %54 : vector<8x1xf32> to vector<8x8xf32>
    %56 = arith.mulf %51, %55 : vector<8x8xf32>
    %cst_28 = arith.constant dense<0.000000e+00> : vector<8x8xf32>
    %57 = tpu.matmul %56, %39, %cst_28 {dimension_numbers = #tpu.dot_dimension_numbers<[1], [0], [0], [1], [0, 0, 1, 1], [], []>} : vector<8x8xf32>, vector<8x8xf32>, vector<8x8xf32> -> vector<8x8xf32>
    %c0_29 = arith.constant 0 : index
    %c8 = arith.constant 8 : index
    %58 = vector.load %arg16[%c0_29, %c8] : memref<16x32xf32, #tpu.memory_space<vmem>>, vector<8x8xf32>
    tpu.vector_store %arg16[%c0_29, %c8], %57 {strides = array<i32>} : memref<16x32xf32, #tpu.memory_space<vmem>>, vector<8x8xf32>,
    %59 = vector.extract_strided_slice %14 {offsets = [0, 16], sizes = [8, 8], strides = [1, 1]} : vector<16x96xf32> to vector<8x8xf32>
    %60 = vector.extract_strided_slice %14 {offsets = [0, 48], sizes = [8, 8], strides = [1, 1]} : vector<16x96xf32> to vector<8x8xf32>
    %61 = vector.extract_strided_slice %14 {offsets = [0, 80], sizes = [8, 8], strides = [1, 1]} : vector<16x96xf32> to vector<8x8xf32>
    %62 = tpu.transpose %60, [1, 0] : vector<8x8xf32> -> vector<8x8xf32>
    %cst_30 = arith.constant dense<0.000000e+00> : vector<8x8xf32>
    %63 = tpu.matmul %59, %62, %cst_30 {dimension_numbers = #tpu.dot_dimension_numbers<[1], [0], [0], [1], [0, 0, 1, 1], [], []>} : vector<8x8xf32>, vector<8x8xf32>, vector<8x8xf32> -> vector<8x8xf32>
    %cst_31 = arith.constant 0.353553385 : f32
    %64 = vector.broadcast %cst_31 : f32 to vector<8x8xf32>
    %65 = arith.mulf %63, %64 : vector<8x8xf32>
    %c0_32 = arith.constant 0 : index
    %c2 = arith.constant 2 : index
    %c0_33 = arith.constant 0 : index
    %c0_34 = arith.constant 0 : index
    %66 = vector.load %arg2[%c0_32, %c2, %c0_33, %c0_34] : memref<2x4x8x8xf32, #tpu.memory_space<vmem>>, vector<1x1x8x8xf32>
    %67 = vector.shape_cast %66 : vector<1x1x8x8xf32> to vector<8x8xf32>
    %68 = arith.addf %65, %67 : vector<8x8xf32>
    %cst_35 = arith.constant dense<0xFF800000> : vector<8xf32>
    %69 = vector.multi_reduction <maximumf>, %68, %cst_35 [1] : vector<8x8xf32> to vector<8xf32>
    %70 = vector.shape_cast %69 : vector<8xf32> to vector<8x1xf32>
    %71 = vector.broadcast %70 : vector<8x1xf32> to vector<8x8xf32>
    %72 = arith.subf %68, %71 : vector<8x8xf32>
    %73 = math.exp %72 : vector<8x8xf32>
    %cst_36 = arith.constant dense<0.000000e+00> : vector<8xf32>
    %74 = vector.multi_reduction <add>, %73, %cst_36 [1] : vector<8x8xf32> to vector<8xf32>
    %75 = vector.shape_cast %74 : vector<8xf32> to vector<8x1xf32>
    %76 = tpu.reciprocal %75 {approx = true} : vector<8x1xf32> -> vector<8x1xf32>
    %77 = vector.broadcast %76 : vector<8x1xf32> to vector<8x8xf32>
    %78 = arith.mulf %73, %77 : vector<8x8xf32>
    %cst_37 = arith.constant dense<0.000000e+00> : vector<8x8xf32>
    %79 = tpu.matmul %78, %61, %cst_37 {dimension_numbers = #tpu.dot_dimension_numbers<[1], [0], [0], [1], [0, 0, 1, 1], [], []>} : vector<8x8xf32>, vector<8x8xf32>, vector<8x8xf32> -> vector<8x8xf32>
    %c0_38 = arith.constant 0 : index
    %c16 = arith.constant 16 : index
    %80 = vector.load %arg16[%c0_38, %c16] : memref<16x32xf32, #tpu.memory_space<vmem>>, vector<8x8xf32>
    tpu.vector_store %arg16[%c0_38, %c16], %79 {strides = array<i32>} : memref<16x32xf32, #tpu.memory_space<vmem>>, vector<8x8xf32>,
    %81 = vector.extract_strided_slice %14 {offsets = [0, 24], sizes = [8, 8], strides = [1, 1]} : vector<16x96xf32> to vector<8x8xf32>
    %82 = vector.extract_strided_slice %14 {offsets = [0, 56], sizes = [8, 8], strides = [1, 1]} : vector<16x96xf32> to vector<8x8xf32>
    %83 = vector.extract_strided_slice %14 {offsets = [0, 88], sizes = [8, 8], strides = [1, 1]} : vector<16x96xf32> to vector<8x8xf32>
    %84 = tpu.transpose %82, [1, 0] : vector<8x8xf32> -> vector<8x8xf32>
    %cst_39 = arith.constant dense<0.000000e+00> : vector<8x8xf32>
    %85 = tpu.matmul %81, %84, %cst_39 {dimension_numbers = #tpu.dot_dimension_numbers<[1], [0], [0], [1], [0, 0, 1, 1], [], []>} : vector<8x8xf32>, vector<8x8xf32>, vector<8x8xf32> -> vector<8x8xf32>
    %cst_40 = arith.constant 0.353553385 : f32
    %86 = vector.broadcast %cst_40 : f32 to vector<8x8xf32>
    %87 = arith.mulf %85, %86 : vector<8x8xf32>
    %c0_41 = arith.constant 0 : index
    %c3 = arith.constant 3 : index
    %c0_42 = arith.constant 0 : index
    %c0_43 = arith.constant 0 : index
    %88 = vector.load %arg2[%c0_41, %c3, %c0_42, %c0_43] : memref<2x4x8x8xf32, #tpu.memory_space<vmem>>, vector<1x1x8x8xf32>
    %89 = vector.shape_cast %88 : vector<1x1x8x8xf32> to vector<8x8xf32>
    %90 = arith.addf %87, %89 : vector<8x8xf32>
    %cst_44 = arith.constant dense<0xFF800000> : vector<8xf32>
    %91 = vector.multi_reduction <maximumf>, %90, %cst_44 [1] : vector<8x8xf32> to vector<8xf32>
    %92 = vector.shape_cast %91 : vector<8xf32> to vector<8x1xf32>
    %93 = vector.broadcast %92 : vector<8x1xf32> to vector<8x8xf32>
    %94 = arith.subf %90, %93 : vector<8x8xf32>
    %95 = math.exp %94 : vector<8x8xf32>
    %cst_45 = arith.constant dense<0.000000e+00> : vector<8xf32>
    %96 = vector.multi_reduction <add>, %95, %cst_45 [1] : vector<8x8xf32> to vector<8xf32>
    %97 = vector.shape_cast %96 : vector<8xf32> to vector<8x1xf32>
    %98 = tpu.reciprocal %97 {approx = true} : vector<8x1xf32> -> vector<8x1xf32>
    %99 = vector.broadcast %98 : vector<8x1xf32> to vector<8x8xf32>
    %100 = arith.mulf %95, %99 : vector<8x8xf32>
    %cst_46 = arith.constant dense<0.000000e+00> : vector<8x8xf32>
    %101 = tpu.matmul %100, %83, %cst_46 {dimension_numbers = #tpu.dot_dimension_numbers<[1], [0], [0], [1], [0, 0, 1, 1], [], []>} : vector<8x8xf32>, vector<8x8xf32>, vector<8x8xf32> -> vector<8x8xf32>
    %c0_47 = arith.constant 0 : index
    %c24 = arith.constant 24 : index
    %102 = vector.load %arg16[%c0_47, %c24] : memref<16x32xf32, #tpu.memory_space<vmem>>, vector<8x8xf32>
    tpu.vector_store %arg16[%c0_47, %c24], %101 {strides = array<i32>} : memref<16x32xf32, #tpu.memory_space<vmem>>, vector<8x8xf32>,
    %103 = vector.extract_strided_slice %14 {offsets = [8, 0], sizes = [8, 8], strides = [1, 1]} : vector<16x96xf32> to vector<8x8xf32>
    %104 = vector.extract_strided_slice %14 {offsets = [8, 32], sizes = [8, 8], strides = [1, 1]} : vector<16x96xf32> to vector<8x8xf32>
    %105 = vector.extract_strided_slice %14 {offsets = [8, 64], sizes = [8, 8], strides = [1, 1]} : vector<16x96xf32> to vector<8x8xf32>
    %106 = tpu.transpose %104, [1, 0] : vector<8x8xf32> -> vector<8x8xf32>
    %cst_48 = arith.constant dense<0.000000e+00> : vector<8x8xf32>
    %107 = tpu.matmul %103, %106, %cst_48 {dimension_numbers = #tpu.dot_dimension_numbers<[1], [0], [0], [1], [0, 0, 1, 1], [], []>} : vector<8x8xf32>, vector<8x8xf32>, vector<8x8xf32> -> vector<8x8xf32>
    %cst_49 = arith.constant 0.353553385 : f32
    %108 = vector.broadcast %cst_49 : f32 to vector<8x8xf32>
    %109 = arith.mulf %107, %108 : vector<8x8xf32>
    %c1_50 = arith.constant 1 : index
    %c0_51 = arith.constant 0 : index
    %c0_52 = arith.constant 0 : index
    %c0_53 = arith.constant 0 : index
    %110 = vector.load %arg2[%c1_50, %c0_51, %c0_52, %c0_53] : memref<2x4x8x8xf32, #tpu.memory_space<vmem>>, vector<1x1x8x8xf32>
    %111 = vector.shape_cast %110 : vector<1x1x8x8xf32> to vector<8x8xf32>
    %112 = arith.addf %109, %111 : vector<8x8xf32>
    %cst_54 = arith.constant dense<0xFF800000> : vector<8xf32>
    %113 = vector.multi_reduction <maximumf>, %112, %cst_54 [1] : vector<8x8xf32> to vector<8xf32>
    %114 = vector.shape_cast %113 : vector<8xf32> to vector<8x1xf32>
    %115 = vector.broadcast %114 : vector<8x1xf32> to vector<8x8xf32>
    %116 = arith.subf %112, %115 : vector<8x8xf32>
    %117 = math.exp %116 : vector<8x8xf32>
    %cst_55 = arith.constant dense<0.000000e+00> : vector<8xf32>
    %118 = vector.multi_reduction <add>, %117, %cst_55 [1] : vector<8x8xf32> to vector<8xf32>
    %119 = vector.shape_cast %118 : vector<8xf32> to vector<8x1xf32>
    %120 = tpu.reciprocal %119 {approx = true} : vector<8x1xf32> -> vector<8x1xf32>
    %121 = vector.broadcast %120 : vector<8x1xf32> to vector<8x8xf32>
    %122 = arith.mulf %117, %121 : vector<8x8xf32>
    %cst_56 = arith.constant dense<0.000000e+00> : vector<8x8xf32>
    %123 = tpu.matmul %122, %105, %cst_56 {dimension_numbers = #tpu.dot_dimension_numbers<[1], [0], [0], [1], [0, 0, 1, 1], [], []>} : vector<8x8xf32>, vector<8x8xf32>, vector<8x8xf32> -> vector<8x8xf32>
    %c8_57 = arith.constant 8 : index
    %c0_58 = arith.constant 0 : index
    %124 = vector.load %arg16[%c8_57, %c0_58] : memref<16x32xf32, #tpu.memory_space<vmem>>, vector<8x8xf32>
    tpu.vector_store %arg16[%c8_57, %c0_58], %123 {strides = array<i32>} : memref<16x32xf32, #tpu.memory_space<vmem>>, vector<8x8xf32>,
    %125 = vector.extract_strided_slice %14 {offsets = [8, 8], sizes = [8, 8], strides = [1, 1]} : vector<16x96xf32> to vector<8x8xf32>
    %126 = vector.extract_strided_slice %14 {offsets = [8, 40], sizes = [8, 8], strides = [1, 1]} : vector<16x96xf32> to vector<8x8xf32>
    %127 = vector.extract_strided_slice %14 {offsets = [8, 72], sizes = [8, 8], strides = [1, 1]} : vector<16x96xf32> to vector<8x8xf32>
    %128 = tpu.transpose %126, [1, 0] : vector<8x8xf32> -> vector<8x8xf32>
    %cst_59 = arith.constant dense<0.000000e+00> : vector<8x8xf32>
    %129 = tpu.matmul %125, %128, %cst_59 {dimension_numbers = #tpu.dot_dimension_numbers<[1], [0], [0], [1], [0, 0, 1, 1], [], []>} : vector<8x8xf32>, vector<8x8xf32>, vector<8x8xf32> -> vector<8x8xf32>
    %cst_60 = arith.constant 0.353553385 : f32
    %130 = vector.broadcast %cst_60 : f32 to vector<8x8xf32>
    %131 = arith.mulf %129, %130 : vector<8x8xf32>
    %c1_61 = arith.constant 1 : index
    %c1_62 = arith.constant 1 : index
    %c0_63 = arith.constant 0 : index
    %c0_64 = arith.constant 0 : index
    %132 = vector.load %arg2[%c1_61, %c1_62, %c0_63, %c0_64] : memref<2x4x8x8xf32, #tpu.memory_space<vmem>>, vector<1x1x8x8xf32>
    %133 = vector.shape_cast %132 : vector<1x1x8x8xf32> to vector<8x8xf32>
    %134 = arith.addf %131, %133 : vector<8x8xf32>
    %cst_65 = arith.constant dense<0xFF800000> : vector<8xf32>
    %135 = vector.multi_reduction <maximumf>, %134, %cst_65 [1] : vector<8x8xf32> to vector<8xf32>
    %136 = vector.shape_cast %135 : vector<8xf32> to vector<8x1xf32>
    %137 = vector.broadcast %136 : vector<8x1xf32> to vector<8x8xf32>
    %138 = arith.subf %134, %137 : vector<8x8xf32>
    %139 = math.exp %138 : vector<8x8xf32>
    %cst_66 = arith.constant dense<0.000000e+00> : vector<8xf32>
    %140 = vector.multi_reduction <add>, %139, %cst_66 [1] : vector<8x8xf32> to vector<8xf32>
    %141 = vector.shape_cast %140 : vector<8xf32> to vector<8x1xf32>
    %142 = tpu.reciprocal %141 {approx = true} : vector<8x1xf32> -> vector<8x1xf32>
    %143 = vector.broadcast %142 : vector<8x1xf32> to vector<8x8xf32>
    %144 = arith.mulf %139, %143 : vector<8x8xf32>
    %cst_67 = arith.constant dense<0.000000e+00> : vector<8x8xf32>
    %145 = tpu.matmul %144, %127, %cst_67 {dimension_numbers = #tpu.dot_dimension_numbers<[1], [0], [0], [1], [0, 0, 1, 1], [], []>} : vector<8x8xf32>, vector<8x8xf32>, vector<8x8xf32> -> vector<8x8xf32>
    %c8_68 = arith.constant 8 : index
    %c8_69 = arith.constant 8 : index
    %146 = vector.load %arg16[%c8_68, %c8_69] : memref<16x32xf32, #tpu.memory_space<vmem>>, vector<8x8xf32>
    tpu.vector_store %arg16[%c8_68, %c8_69], %145 {strides = array<i32>} : memref<16x32xf32, #tpu.memory_space<vmem>>, vector<8x8xf32>,
    %147 = vector.extract_strided_slice %14 {offsets = [8, 16], sizes = [8, 8], strides = [1, 1]} : vector<16x96xf32> to vector<8x8xf32>
    %148 = vector.extract_strided_slice %14 {offsets = [8, 48], sizes = [8, 8], strides = [1, 1]} : vector<16x96xf32> to vector<8x8xf32>
    %149 = vector.extract_strided_slice %14 {offsets = [8, 80], sizes = [8, 8], strides = [1, 1]} : vector<16x96xf32> to vector<8x8xf32>
    %150 = tpu.transpose %148, [1, 0] : vector<8x8xf32> -> vector<8x8xf32>
    %cst_70 = arith.constant dense<0.000000e+00> : vector<8x8xf32>
    %151 = tpu.matmul %147, %150, %cst_70 {dimension_numbers = #tpu.dot_dimension_numbers<[1], [0], [0], [1], [0, 0, 1, 1], [], []>} : vector<8x8xf32>, vector<8x8xf32>, vector<8x8xf32> -> vector<8x8xf32>
    %cst_71 = arith.constant 0.353553385 : f32
    %152 = vector.broadcast %cst_71 : f32 to vector<8x8xf32>
    %153 = arith.mulf %151, %152 : vector<8x8xf32>
    %c1_72 = arith.constant 1 : index
    %c2_73 = arith.constant 2 : index
    %c0_74 = arith.constant 0 : index
    %c0_75 = arith.constant 0 : index
    %154 = vector.load %arg2[%c1_72, %c2_73, %c0_74, %c0_75] : memref<2x4x8x8xf32, #tpu.memory_space<vmem>>, vector<1x1x8x8xf32>
    %155 = vector.shape_cast %154 : vector<1x1x8x8xf32> to vector<8x8xf32>
    %156 = arith.addf %153, %155 : vector<8x8xf32>
    %cst_76 = arith.constant dense<0xFF800000> : vector<8xf32>
    %157 = vector.multi_reduction <maximumf>, %156, %cst_76 [1] : vector<8x8xf32> to vector<8xf32>
    %158 = vector.shape_cast %157 : vector<8xf32> to vector<8x1xf32>
    %159 = vector.broadcast %158 : vector<8x1xf32> to vector<8x8xf32>
    %160 = arith.subf %156, %159 : vector<8x8xf32>
    %161 = math.exp %160 : vector<8x8xf32>
    %cst_77 = arith.constant dense<0.000000e+00> : vector<8xf32>
    %162 = vector.multi_reduction <add>, %161, %cst_77 [1] : vector<8x8xf32> to vector<8xf32>
    %163 = vector.shape_cast %162 : vector<8xf32> to vector<8x1xf32>
    %164 = tpu.reciprocal %163 {approx = true} : vector<8x1xf32> -> vector<8x1xf32>
    %165 = vector.broadcast %164 : vector<8x1xf32> to vector<8x8xf32>
    %166 = arith.mulf %161, %165 : vector<8x8xf32>
    %cst_78 = arith.constant dense<0.000000e+00> : vector<8x8xf32>
    %167 = tpu.matmul %166, %149, %cst_78 {dimension_numbers = #tpu.dot_dimension_numbers<[1], [0], [0], [1], [0, 0, 1, 1], [], []>} : vector<8x8xf32>, vector<8x8xf32>, vector<8x8xf32> -> vector<8x8xf32>
    %c8_79 = arith.constant 8 : index
    %c16_80 = arith.constant 16 : index
    %168 = vector.load %arg16[%c8_79, %c16_80] : memref<16x32xf32, #tpu.memory_space<vmem>>, vector<8x8xf32>
    tpu.vector_store %arg16[%c8_79, %c16_80], %167 {strides = array<i32>} : memref<16x32xf32, #tpu.memory_space<vmem>>, vector<8x8xf32>,
    %169 = vector.extract_strided_slice %14 {offsets = [8, 24], sizes = [8, 8], strides = [1, 1]} : vector<16x96xf32> to vector<8x8xf32>
    %170 = vector.extract_strided_slice %14 {offsets = [8, 56], sizes = [8, 8], strides = [1, 1]} : vector<16x96xf32> to vector<8x8xf32>
    %171 = vector.extract_strided_slice %14 {offsets = [8, 88], sizes = [8, 8], strides = [1, 1]} : vector<16x96xf32> to vector<8x8xf32>
    %172 = tpu.transpose %170, [1, 0] : vector<8x8xf32> -> vector<8x8xf32>
    %cst_81 = arith.constant dense<0.000000e+00> : vector<8x8xf32>
    %173 = tpu.matmul %169, %172, %cst_81 {dimension_numbers = #tpu.dot_dimension_numbers<[1], [0], [0], [1], [0, 0, 1, 1], [], []>} : vector<8x8xf32>, vector<8x8xf32>, vector<8x8xf32> -> vector<8x8xf32>
    %cst_82 = arith.constant 0.353553385 : f32
    %174 = vector.broadcast %cst_82 : f32 to vector<8x8xf32>
    %175 = arith.mulf %173, %174 : vector<8x8xf32>
    %c1_83 = arith.constant 1 : index
    %c3_84 = arith.constant 3 : index
    %c0_85 = arith.constant 0 : index
    %c0_86 = arith.constant 0 : index
    %176 = vector.load %arg2[%c1_83, %c3_84, %c0_85, %c0_86] : memref<2x4x8x8xf32, #tpu.memory_space<vmem>>, vector<1x1x8x8xf32>
    %177 = vector.shape_cast %176 : vector<1x1x8x8xf32> to vector<8x8xf32>
    %178 = arith.addf %175, %177 : vector<8x8xf32>
    %cst_87 = arith.constant dense<0xFF800000> : vector<8xf32>
    %179 = vector.multi_reduction <maximumf>, %178, %cst_87 [1] : vector<8x8xf32> to vector<8xf32>
    %180 = vector.shape_cast %179 : vector<8xf32> to vector<8x1xf32>
    %181 = vector.broadcast %180 : vector<8x1xf32> to vector<8x8xf32>
    %182 = arith.subf %178, %181 : vector<8x8xf32>
    %183 = math.exp %182 : vector<8x8xf32>
    %cst_88 = arith.constant dense<0.000000e+00> : vector<8xf32>
    %184 = vector.multi_reduction <add>, %183, %cst_88 [1] : vector<8x8xf32> to vector<8xf32>
    %185 = vector.shape_cast %184 : vector<8xf32> to vector<8x1xf32>
    %186 = tpu.reciprocal %185 {approx = true} : vector<8x1xf32> -> vector<8x1xf32>
    %187 = vector.broadcast %186 : vector<8x1xf32> to vector<8x8xf32>
    %188 = arith.mulf %183, %187 : vector<8x8xf32>
    %cst_89 = arith.constant dense<0.000000e+00> : vector<8x8xf32>
    %189 = tpu.matmul %188, %171, %cst_89 {dimension_numbers = #tpu.dot_dimension_numbers<[1], [0], [0], [1], [0, 0, 1, 1], [], []>} : vector<8x8xf32>, vector<8x8xf32>, vector<8x8xf32> -> vector<8x8xf32>
    %c8_90 = arith.constant 8 : index
    %c24_91 = arith.constant 24 : index
    %190 = vector.load %arg16[%c8_90, %c24_91] : memref<16x32xf32, #tpu.memory_space<vmem>>, vector<8x8xf32>
    tpu.vector_store %arg16[%c8_90, %c24_91], %189 {strides = array<i32>} : memref<16x32xf32, #tpu.memory_space<vmem>>, vector<8x8xf32>,
    %c0_92 = arith.constant 0 : index
    %c0_93 = arith.constant 0 : index
    %191 = vector.load %arg16[%c0_92, %c0_93] : memref<16x32xf32, #tpu.memory_space<vmem>>, vector<16x32xf32>
    %c0_94 = arith.constant 0 : index
    %c0_95 = arith.constant 0 : index
    %192 = vector.load %arg7[%c0_94, %c0_95] : memref<32x32xf32, #tpu.memory_space<vmem>>, vector<32x32xf32>
    %193 = arith.truncf %191 : vector<16x32xf32> to vector<16x32xbf16>
    %194 = arith.truncf %192 : vector<32x32xf32> to vector<32x32xbf16>
    %cst_96 = arith.constant dense<0.000000e+00> : vector<16x32xf32>
    %195 = tpu.matmul %193, %194, %cst_96 {dimension_numbers = #tpu.dot_dimension_numbers<[1], [0], [0], [1], [0, 0, 1, 1], [], []>} : vector<16x32xbf16>, vector<32x32xbf16>, vector<16x32xf32> -> vector<16x32xf32>
    %196 = arith.addf %7, %195 : vector<16x32xf32>
    %c0_97 = arith.constant 0 : index
    %c0_98 = arith.constant 0 : index
    %197 = vector.load %arg8[%c0_97, %c0_98] : memref<1x32xf32, #tpu.memory_space<vmem>>, vector<1x32xf32>
    %198 = vector.broadcast %197 : vector<1x32xf32> to vector<16x32xf32>
    %199 = arith.addf %196, %198 : vector<16x32xf32>
    %c0_99 = arith.constant 0 : index
    %c0_100 = arith.constant 0 : index
    %200 = vector.load %arg9[%c0_99, %c0_100] : memref<32x64xf32, #tpu.memory_space<vmem>>, vector<32x64xf32>
    %201 = arith.truncf %199 : vector<16x32xf32> to vector<16x32xbf16>
    %202 = arith.truncf %200 : vector<32x64xf32> to vector<32x64xbf16>
    %cst_101 = arith.constant dense<0.000000e+00> : vector<16x64xf32>
    %203 = tpu.matmul %201, %202, %cst_101 {dimension_numbers = #tpu.dot_dimension_numbers<[1], [0], [0], [1], [0, 0, 1, 1], [], []>} : vector<16x32xbf16>, vector<32x64xbf16>, vector<16x64xf32> -> vector<16x64xf32>
    %c0_102 = arith.constant 0 : index
    %c0_103 = arith.constant 0 : index
    %204 = vector.load %arg10[%c0_102, %c0_103] : memref<1x64xf32, #tpu.memory_space<vmem>>, vector<1x64xf32>
    %205 = vector.broadcast %204 : vector<1x64xf32> to vector<16x64xf32>
    %206 = arith.addf %203, %205 : vector<16x64xf32>
    %cst_104 = arith.constant 0.000000e+00 : f32
    %207 = vector.broadcast %cst_104 : f32 to vector<16x64xf32>
    %208 = arith.maximumf %206, %207 : vector<16x64xf32>
    %c0_105 = arith.constant 0 : index
    %c0_106 = arith.constant 0 : index
    %209 = vector.load %arg11[%c0_105, %c0_106] : memref<64x32xf32, #tpu.memory_space<vmem>>, vector<64x32xf32>
    %210 = arith.truncf %208 : vector<16x64xf32> to vector<16x64xbf16>
    %211 = arith.truncf %209 : vector<64x32xf32> to vector<64x32xbf16>
    %cst_107 = arith.constant dense<0.000000e+00> : vector<16x32xf32>
    %212 = tpu.matmul %210, %211, %cst_107 {dimension_numbers = #tpu.dot_dimension_numbers<[1], [0], [0], [1], [0, 0, 1, 1], [], []>} : vector<16x64xbf16>, vector<64x32xbf16>, vector<16x32xf32> -> vector<16x32xf32>
    %213 = arith.addf %199, %212 : vector<16x32xf32>
    %c0_108 = arith.constant 0 : index
    %c0_109 = arith.constant 0 : index
    %214 = vector.load %arg12[%c0_108, %c0_109] : memref<1x32xf32, #tpu.memory_space<vmem>>, vector<1x32xf32>
    %215 = vector.broadcast %214 : vector<1x32xf32> to vector<16x32xf32>
    %216 = arith.addf %213, %215 : vector<16x32xf32>
    %c0_110 = arith.constant 0 : index
    %c0_111 = arith.constant 0 : index
    %217 = vector.load %arg13[%c0_110, %c0_111] : memref<32x28xf32, #tpu.memory_space<vmem>>, vector<32x28xf32>
    %218 = arith.truncf %216 : vector<16x32xf32> to vector<16x32xbf16>
    %219 = arith.truncf %217 : vector<32x28xf32> to vector<32x28xbf16>
    %cst_112 = arith.constant dense<0.000000e+00> : vector<16x28xf32>
    %220 = tpu.matmul %218, %219, %cst_112 {dimension_numbers = #tpu.dot_dimension_numbers<[1], [0], [0], [1], [0, 0, 1, 1], [], []>} : vector<16x32xbf16>, vector<32x28xbf16>, vector<16x28xf32> -> vector<16x28xf32>
    %c0_113 = arith.constant 0 : index
    %c0_114 = arith.constant 0 : index
    %221 = vector.load %arg14[%c0_113, %c0_114] : memref<1x28xf32, #tpu.memory_space<vmem>>, vector<1x28xf32>
    %222 = vector.broadcast %221 : vector<1x28xf32> to vector<16x28xf32>
    %223 = arith.addf %220, %222 : vector<16x28xf32>
    %c0_115 = arith.constant 0 : index
    %c0_116 = arith.constant 0 : index
    %224 = vector.load %arg15[%c0_115, %c0_116] : memref<16x28xf32, #tpu.memory_space<vmem>>, vector<16x28xf32>
    tpu.vector_store %arg15[%c0_115, %c0_116], %223 {strides = array<i32>} : memref<16x28xf32, #tpu.memory_space<vmem>>, vector<16x28xf32>,
    return
  }
  func.func @transform_0(%arg0: i32) -> (i32, i32) {
    %c0_i32 = arith.constant 0 : i32
    %c0_i32_0 = arith.constant 0 : i32
    %c0_i32_1 = arith.constant 0 : i32
    return %c0_i32, %c0_i32_0 : i32, i32
  }
  func.func @transform_1(%arg0: i32) -> (i32, i32, i32, i32) {
    %c0_i32 = arith.constant 0 : i32
    %c0_i32_0 = arith.constant 0 : i32
    %c0_i32_1 = arith.constant 0 : i32
    %c0_i32_2 = arith.constant 0 : i32
    %c0_i32_3 = arith.constant 0 : i32
    return %c0_i32, %c0_i32_0, %c0_i32_1, %c0_i32_2 : i32, i32, i32, i32
  }
  func.func @transform_2(%arg0: i32) -> (i32, i32) {
    %c0_i32 = arith.constant 0 : i32
    %c0_i32_0 = arith.constant 0 : i32
    %c0_i32_1 = arith.constant 0 : i32
    return %c0_i32, %c0_i32_0 : i32, i32
  }
  func.func @transform_3(%arg0: i32) -> (i32, i32) {
    %c0_i32 = arith.constant 0 : i32
    %c0_i32_0 = arith.constant 0 : i32
    %c0_i32_1 = arith.constant 0 : i32
    return %c0_i32, %c0_i32_0 : i32, i32
  }
  func.func @transform_4(%arg0: i32) -> (i32, i32) {
    %c0_i32 = arith.constant 0 : i32
    %c0_i32_0 = arith.constant 0 : i32
    %c0_i32_1 = arith.constant 0 : i32
    return %c0_i32, %c0_i32_0 : i32, i32
  }
  func.func @transform_5(%arg0: i32) -> (i32, i32) {
    %c0_i32 = arith.constant 0 : i32
    %c0_i32_0 = arith.constant 0 : i32
    %c0_i32_1 = arith.constant 0 : i32
    return %c0_i32, %c0_i32_0 : i32, i32
  }
  func.func @transform_6(%arg0: i32) -> (i32, i32) {
    %c0_i32 = arith.constant 0 : i32
    %c0_i32_0 = arith.constant 0 : i32
    %c0_i32_1 = arith.constant 0 : i32
    return %c0_i32, %c0_i32_0 : i32, i32
  }
  func.func @transform_7(%arg0: i32) -> (i32, i32) {
    %c0_i32 = arith.constant 0 : i32
    %c0_i32_0 = arith.constant 0 : i32
    %c0_i32_1 = arith.constant 0 : i32
    return %c0_i32, %c0_i32_0 : i32, i32
  }
  func.func @transform_8(%arg0: i32) -> (i32, i32) {
    %c0_i32 = arith.constant 0 : i32
    %c0_i32_0 = arith.constant 0 : i32
    %c0_i32_1 = arith.constant 0 : i32
    return %c0_i32, %c0_i32_0 : i32, i32
  }
  func.func @transform_9(%arg0: i32) -> (i32, i32) {
    %c0_i32 = arith.constant 0 : i32
    %c0_i32_0 = arith.constant 0 : i32
    %c0_i32_1 = arith.constant 0 : i32
    return %c0_i32, %c0_i32_0 : i32, i32
  }
  func.func @transform_10(%arg0: i32) -> (i32, i32) {
    %c0_i32 = arith.constant 0 : i32
    %c0_i32_0 = arith.constant 0 : i32
    %c0_i32_1 = arith.constant 0 : i32
    return %c0_i32, %c0_i32_0 : i32, i32
  }
  func.func @transform_11(%arg0: i32) -> (i32, i32) {
    %c0_i32 = arith.constant 0 : i32
    %c0_i32_0 = arith.constant 0 : i32
    %c0_i32_1 = arith.constant 0 : i32
    return %c0_i32, %c0_i32_0 : i32, i32
  }
  func.func @transform_12(%arg0: i32) -> (i32, i32) {
    %c0_i32 = arith.constant 0 : i32
    %c0_i32_0 = arith.constant 0 : i32
    %c0_i32_1 = arith.constant 0 : i32
    return %c0_i32, %c0_i32_0 : i32, i32
  }
  func.func @transform_13(%arg0: i32) -> (i32, i32) {
    %c0_i32 = arith.constant 0 : i32
    %c0_i32_0 = arith.constant 0 : i32
    %c0_i32_1 = arith.constant 0 : i32
    return %c0_i32, %c0_i32_0 : i32, i32
  }
  func.func @transform_14(%arg0: i32) -> (i32, i32) {
    %c0_i32 = arith.constant 0 : i32
    %c0_i32_0 = arith.constant 0 : i32
    %c0_i32_1 = arith.constant 0 : i32
    return %c0_i32, %c0_i32_0 : i32, i32
  }
}

</mosaic_0001>

<bundles_post_ra>
// kernel: diffpp_forward.4
= control target key start
LH: loop header
LB: loop body
LE: loop exit
PB: predicated region body
PF: predicated region fallthrough
CT: control target
= control target key end

     0   :  { %vm222_vm0 = vcmask 261120   ;;  %vm378_vm1 = vcmask 130048   ;;  %vm655_vm2 = vcmask 162816   ;;  %s1108_s1 = inlined_call_operand.vmem [shape: f32[128,32], index: 1, kind: input, shape index: {}]   ;;  %s1109_s0 = inlined_call_operand.vmem [shape: f32[128,128], index: 0, kind: input, shape index: {}]   ;;  %s1110_s3 = inlined_call_operand.vmem [shape: f32[32,16], index: 3, kind: input, shape index: {}]   ;;  %s1111_s5 = inlined_call_operand.vmem [shape: f32[16,16], index: 5, kind: input, shape index: {}]   ;;  %s1112_s2 = inlined_call_operand.vmem [shape: f32[1,32], index: 2, kind: input, shape index: {}]   ;;  %s1113_s7 = inlined_call_operand.vmem [shape: f32[16,20], index: 7, kind: input, shape index: {}]   ;;  %s1114_s4 = inlined_call_operand.vmem [shape: f32[1,16], index: 4, kind: input, shape index: {}]   ;;  %s1115_s6 = inlined_call_operand.vmem [shape: f32[1,16], index: 6, kind: input, shape index: {}]   ;;  %s1116_s8 = inlined_call_operand.vmem [shape: f32[1,20], index: 8, kind: input, shape index: {}]   ;;  %s1117_s9 = inlined_call_operand.vmem [shape: f32[128,20], index: 9, kind: output, shape index: {}]  }
   0x1   :  { %v49_v0 = vld [vmem:[%s1108_s1] sm:$0xff]  ;;  %v50_v1 = vld [vmem:[%s1108_s1 + $0x8] sm:$0xff]  ;;  %v51_v2 = vld [vmem:[%s1108_s1 + $0x10] sm:$0xff] }
   0x2   :  { %v73_v3 = vpack.c.bf16 %v50_v1, %v49_v0  ;;  %v52_v4 = vld [vmem:[%s1108_s1 + $0x18] sm:$0xff]  ;;  %v53_v6 = vld [vmem:[%s1108_s1 + $0x20] sm:$0xff]  ;;  %v54_v7 = vld [vmem:[%s1108_s1 + $0x28] sm:$0xff] }
   0x3   :  { %v74_v5 = vpack.c.bf16 %v52_v4, %v51_v2  ;;  %v75_v8 = vpack.c.bf16 %v54_v7, %v53_v6  ;;  %v33_v9 = vld [vmem:[%s1109_s0] sm:$0xff]  ;;  %v34_v10 = vld [vmem:[%s1109_s0 + $0x8] sm:$0xff]  ;;  %v55_v11 = vld [vmem:[%s1108_s1 + $0x30] sm:$0xff] }
   0x4   :  { %748 = vmatprep.subr.bf16.mxu0 %v73_v3  ;;  %v56_v12 = vld [vmem:[%s1108_s1 + $0x38] sm:$0xff]  ;;  %v65_v13 = vpack.c.bf16 %v34_v10, %v33_v9  ;;  %v57_v15 = vld [vmem:[%s1108_s1 + $0x40] sm:$0xff]  ;;  %v58_v16 = vld [vmem:[%s1108_s1 + $0x48] sm:$0xff] }
   0x5   :  { %749 = vmatpush3.bf16.msra.mxu0 %v73_v3  ;;  %v76_v14 = vpack.c.bf16 %v56_v12, %v55_v11  ;;  %v77_v17 = vpack.c.bf16 %v58_v16, %v57_v15  ;;  %v59_v18 = vld [vmem:[%s1108_s1 + $0x50] sm:$0xff]  ;;  %v60_v19 = vld [vmem:[%s1108_s1 + $0x58] sm:$0xff]  ;;  %v61_v21 = vld [vmem:[%s1108_s1 + $0x60] sm:$0xff] }
   0x6   :  { %750 = vmatprep.subr.bf16.mxu0 %v74_v5  ;;  %764 = vmatprep.mubr.bf16.mxu0 %v65_v13  ;;  %v78_v20 = vpack.c.bf16 %v60_v19, %v59_v18  ;;  %v62_v22 = vld [vmem:[%s1108_s1 + $0x68] sm:$0xff]  ;;  %v63_v24 = vld [vmem:[%s1108_s1 + $0x70] sm:$0xff]  ;;  %v64_v25 = vld [vmem:[%s1108_s1 + $0x78] sm:$0xff] }
   0x7   :  { %v79_v23 = vpack.c.bf16 %v62_v22, %v61_v21  ;;  %v80_v26 = vpack.c.bf16 %v64_v25, %v63_v24  ;;  %v35_v27 = vld [vmem:[%s1109_s0 + $0x10] sm:$0xff]  ;;  %v36_v28 = vld [vmem:[%s1109_s0 + $0x18] sm:$0xff]  ;;  %v37_v29 = vld [vmem:[%s1109_s0 + $0x20] sm:$0xff] }
   0x8   :  { %v38_v30 = vld [vmem:[%s1109_s0 + $0x28] sm:$0xff]  ;;  %v66_v31 = vpack.c.bf16 %v36_v28, %v35_v27  ;;  %v39_v33 = vld [vmem:[%s1109_s0 + $0x30] sm:$0xff]  ;;  %v40_v34 = vld [vmem:[%s1109_s0 + $0x38] sm:$0xff] }
   0x9   :  { %751 = vmatpush3.bf16.msra.mxu0 %v74_v5  ;;  %v67_v32 = vpack.c.bf16 %v38_v30, %v37_v29  ;;  %v41_v35 = vld [vmem:[%s1109_s0 + $0x40] sm:$0xff]  ;;  %v42_v36 = vld [vmem:[%s1109_s0 + $0x48] sm:$0xff]  ;;  %v68_v37 = vpack.c.bf16 %v40_v34, %v39_v33  ;;  %v43_v39 = vld [vmem:[%s1109_s0 + $0x50] sm:$0xff] }
   0xa   :  { %752 = vmatprep.subr.bf16.mxu0 %v75_v8  ;;  %v69_v38 = vpack.c.bf16 %v42_v36, %v41_v35  ;;  %v44_v40 = vld [vmem:[%s1109_s0 + $0x58] sm:$0xff]  ;;  %v45_v41 = vld [vmem:[%s1109_s0 + $0x60] sm:$0xff]  ;;  %v46_v42 = vld [vmem:[%s1109_s0 + $0x68] sm:$0xff] }
   0xb   :  { %v70_v43 = vpack.c.bf16 %v44_v40, %v43_v39  ;;  %v71_v44 = vpack.c.bf16 %v46_v42, %v45_v41  ;;  %v47_v45 = vld [vmem:[%s1109_s0 + $0x70] sm:$0xff]  ;;  %v48_v46 = vld [vmem:[%s1109_s0 + $0x78] sm:$0xff]  ;;  %v201_v48 = vld [vmem:[%s1110_s3] sm:$0xff] }
   0xc   :  { %v72_v47 = vpack.c.bf16 %v48_v46, %v47_v45  ;;  %v202_v49 = vld [vmem:[%s1110_s3 + $0x8] sm:$0xff]  ;;  %v203_v51 = vld [vmem:[%s1110_s3 + $0x10] sm:$0xff]  ;;  %v204_v52 = vld [vmem:[%s1110_s3 + $0x18] sm:$0xff] }
   0xd   :  { %753 = vmatpush3.bf16.msra.mxu0 %v75_v8  ;;  %v213_v50 = vpack.c.bf16 %v202_v49, %v201_v48  ;;  %v214_v53 = vpack.c.bf16 %v204_v52, %v203_v51  ;;  %v360_v54 = vld [vmem:[%s1111_s5] sm:$0xff]  ;;  %v361_v55 = vld [vmem:[%s1111_s5 + $0x8] sm:$0xff] }
   0xe   :  { %754 = vmatprep.subr.bf16.mxu0 %v76_v14  ;;  %v370_v56 = vpack.c.bf16 %v361_v55, %v360_v54  ;;  %v676_v57 = vld [vmem:[%s1112_s2] ss:$0 sm:$0xff]  ;;  %v517_v51 = vld [vmem:[%s1113_s7 + $0x8] sm:$0xff] }
   0xf   :  { %780 = vmatprep.subr.bf16.mxu1 %v213_v50 }
  0x10   :  { %781 = vmatpush3.bf16.msra.mxu1 %v213_v50  ;;  %v516_v50 = vld [vmem:[%s1113_s7] sm:$0xff] }
  0x11   :  { %755 = vmatpush3.bf16.msra.mxu0 %v76_v14  ;;  %782 = vmatprep.subr.bf16.mxu1 %v214_v53  ;;  %v526_v52 = vpack.c.bf16 %v517_v51, %v516_v50 }
  0x12   :  { %756 = vmatprep.subr.bf16.mxu0 %v77_v17 }
  0x14   :  { %783 = vmatpush3.bf16.msra.mxu1 %v214_v53  ;;  %v677_v53 = vld [vmem:[%s1114_s4] ss:$0 sm:$0xff] }
  0x15   :  { %757 = vmatpush3.bf16.msra.mxu0 %v77_v17  ;;  %800 = vmatprep.subr.bf16.mxu1 %v370_v56 }
  0x16   :  { %758 = vmatprep.subr.bf16.mxu0 %v78_v20 }
  0x19   :  { %759 = vmatpush3.bf16.msra.mxu0 %v78_v20 }
  0x1a   :  { %760 = vmatprep.subr.bf16.mxu0 %v79_v23 }
  0x1d   :  { %761 = vmatpush3.bf16.msra.mxu0 %v79_v23 }
  0x1e   :  { %762 = vmatprep.subr.bf16.mxu0 %v80_v26 }
  0x21   :  { %763 = vmatpush3.bf16.msra.mxu0 %v80_v26 }
  0x22   :  { %818 = vmatprep.subr.bf16.mxu0 %v526_v52 }
  0x24   :  { %765 = vmatmul.mubr.bf16.vlgmr.msra.gmra.mrb[0].mxu0 %v66_v31 }
  0x25   :  { %768 = vmatprep.mubr.bf16.mxu0 %v67_v32  ;;  %819 = vmatpush3.bf16.msra.mxu0 %v526_v52 }
  0x2c   :  { %769 = vmatmul.mubr.bf16.gmra.mrb[4].mxu0 %v68_v37 }
  0x2d   :  { %772 = vmatprep.mubr.bf16.mxu0 %v69_v38 }
  0x34   :  { %773 = vmatmul.mubr.bf16.gmra.mrb[8].mxu0 %v70_v43 }
  0x35   :  { %776 = vmatprep.mubr.bf16.mxu0 %v71_v44 }
  0x3c   :  { %777 = vmatmul.mubr.bf16.gmra.mrb[12].mxu0 %v72_v47 }
  0xf7   :  { %v766_v58 = vpop.f32.mrb[0].mxu0 }
  0xf8   :  { %v131_v59 = vadd.f32 %v766_v58, %v676_v57  ;;  %v122_v60 = vpop.f32.mrb[1].mxu0 }
  0xf9   :  { %v123_v61 = vadd.f32 %v676_v57, %v122_v60  ;;  %v767_v62 = vpop.f32.mrb[2].mxu0 }
  0xfa   :  { %v134_v63 = vadd.f32 %v767_v62, %v676_v57  ;;  %v125_v0 = vpop.f32.mrb[3].mxu0  ;;  %v187_v2 = vmax.f32 %v131_v59, 0.0 }
  0xfb   :  { %v126_v1 = vadd.f32 %v676_v57, %v125_v0  ;;  %v185_v4 = vmax.f32 %v123_v61, 0.0 }
  0xfc   :  { %v188_v3 = vmax.f32 %v134_v63, 0.0 }
  0xfd   :  { %v186_v5 = vmax.f32 %v126_v1, 0.0 }
  0xfe   :  { %v206_v6 = vpack.c.bf16 %v188_v3, %v187_v2 }
  0xff   :  { %v770_v7 = vpop.f32.mrb[4].mxu0  ;;  %v205_v8 = vpack.c.bf16 %v186_v5, %v185_v4 }
 0x100   :  { %v147_v9 = vadd.f32 %v770_v7, %v676_v57  ;;  %v138_v10 = vpop.f32.mrb[5].mxu0 }
 0x101   :  { %v139_v11 = vadd.f32 %v676_v57, %v138_v10  ;;  %v771_v12 = vpop.f32.mrb[6].mxu0  ;;  %784 = vmatprep.mubr.msk.bf16.mxu1 %vm222_vm0, %v205_v8 }
 0x102   :  { %v150_v13 = vadd.f32 %v771_v12, %v676_v57  ;;  %v141_v14 = vpop.f32.mrb[7].mxu0  ;;  %785 = vmatmul.mubr.msk.bf16.vlgmr.msra.gmra.mrb[0].mxu1 %vm222_vm0, %v206_v6  ;;  %v191_v16 = vmax.f32 %v147_v9, 0.0 }
 0x103   :  { %v142_v15 = vadd.f32 %v676_v57, %v141_v14  ;;  %801 = vmatpush3.bf16.msra.mxu1 %v370_v56  ;;  %v189_v18 = vmax.f32 %v139_v11, 0.0 }
 0x104   :  { %v192_v17 = vmax.f32 %v150_v13, 0.0  ;;  %836 = vmatprep.subr.bf16.mxu1 %v526_v52 }
 0x105   :  { %v190_v19 = vmax.f32 %v142_v15, 0.0 }
 0x106   :  { %v208_v20 = vpack.c.bf16 %v192_v17, %v191_v16 }
 0x107   :  { %v207_v21 = vpack.c.bf16 %v190_v19, %v189_v18  ;;  %v774_v22 = vpop.f32.mrb[8].mxu0 }
 0x108   :  { %v163_v23 = vadd.f32 %v774_v22, %v676_v57  ;;  %v154_v24 = vpop.f32.mrb[9].mxu0 }
 0x109   :  { %v155_v25 = vadd.f32 %v676_v57, %v154_v24  ;;  %v775_v26 = vpop.f32.mrb[10].mxu0  ;;  %788 = vmatprep.mubr.msk.bf16.mxu1 %vm222_vm0, %v207_v21 }
 0x10a   :  { %v166_v27 = vadd.f32 %v775_v26, %v676_v57  ;;  %v157_v28 = vpop.f32.mrb[11].mxu0  ;;  %789 = vmatmul.mubr.msk.bf16.gmra.mrb[4].mxu1 %vm222_vm0, %v208_v20  ;;  %v195_v30 = vmax.f32 %v163_v23, 0.0 }
 0x10b   :  { %v158_v29 = vadd.f32 %v676_v57, %v157_v28  ;;  %v193_v32 = vmax.f32 %v155_v25, 0.0 }
 0x10c   :  { %v196_v31 = vmax.f32 %v166_v27, 0.0 }
 0x10d   :  { %v194_v33 = vmax.f32 %v158_v29, 0.0 }
 0x10e   :  { %v210_v34 = vpack.c.bf16 %v196_v31, %v195_v30 }
 0x10f   :  { %v209_v35 = vpack.c.bf16 %v194_v33, %v193_v32  ;;  %v778_v36 = vpop.f32.mrb[12].mxu0 }
 0x110   :  { %v179_v37 = vadd.f32 %v778_v36, %v676_v57  ;;  %v170_v38 = vpop.f32.mrb[13].mxu0 }
 0x111   :  { %v171_v39 = vadd.f32 %v676_v57, %v170_v38  ;;  %v779_v40 = vpop.f32.mrb[14].mxu0  ;;  %792 = vmatprep.mubr.msk.bf16.mxu1 %vm222_vm0, %v209_v35 }
 0x112   :  { %v182_v41 = vadd.f32 %v779_v40, %v676_v57  ;;  %v173_v42 = vpop.f32.mrb[15].mxu0  ;;  %793 = vmatmul.mubr.msk.bf16.gmra.mrb[8].mxu1 %vm222_vm0, %v210_v34  ;;  %v199_v44 = vmax.f32 %v179_v37, 0.0 }
 0x113   :  { %v174_v43 = vadd.f32 %v676_v57, %v173_v42  ;;  %v197_v46 = vmax.f32 %v171_v39, 0.0 }
 0x114   :  { %v200_v45 = vmax.f32 %v182_v41, 0.0 }
 0x115   :  { %v198_v47 = vmax.f32 %v174_v43, 0.0 }
 0x116   :  { %v212_v48 = vpack.c.bf16 %v200_v45, %v199_v44 }
 0x117   :  { %v211_v49 = vpack.c.bf16 %v198_v47, %v197_v46  ;;  %v686_v46 = vld [vmem:[%s1115_s6] ss:$0 sm:$0xff] }
 0x119   :  { %796 = vmatprep.mubr.msk.bf16.mxu1 %vm222_vm0, %v211_v49 }
 0x11a   :  { %797 = vmatmul.mubr.msk.bf16.gmra.mrb[12].mxu1 %vm222_vm0, %v212_v48 }
 0x1d5   :  { %v786_v54 = vpop.f32.mrb[0].mxu1 }
 0x1d6   :  { %v290_v55 = vadd.f32 %v786_v54, %v677_v53  ;;  %v281_v56 = vpop.f32.mrb[1].mxu1 }
 0x1d7   :  { %v282_v57 = vadd.f32 %v677_v53, %v281_v56  ;;  %v787_v58 = vpop.f32.mrb[2].mxu1 }
 0x1d8   :  { %v293_v59 = vadd.f32 %v787_v58, %v677_v53  ;;  %v284_v60 = vpop.f32.mrb[3].mxu1  ;;  %v346_v62 = vmax.f32 %v290_v55, 0.0 }
 0x1d9   :  { %v285_v61 = vadd.f32 %v677_v53, %v284_v60  ;;  %v344_v0 = vmax.f32 %v282_v57, 0.0 }
 0x1da   :  { %v347_v63 = vmax.f32 %v293_v59, 0.0 }
 0x1db   :  { %v345_v1 = vmax.f32 %v285_v61, 0.0 }
 0x1dc   :  { %v363_v2 = vpack.c.bf16 %v347_v63, %v346_v62 }
 0x1dd   :  { %v362_v3 = vpack.c.bf16 %v345_v1, %v344_v0  ;;  %v790_v4 = vpop.f32.mrb[4].mxu1 }
 0x1de   :  { %v306_v5 = vadd.f32 %v790_v4, %v677_v53  ;;  %v297_v6 = vpop.f32.mrb[5].mxu1 }
 0x1df   :  { %v298_v7 = vadd.f32 %v677_v53, %v297_v6  ;;  %v791_v8 = vpop.f32.mrb[6].mxu1  ;;  %802 = vmatprep.mubr.msk.bf16.mxu1 %vm378_vm1, %v362_v3 }
 0x1e0   :  { %v309_v9 = vadd.f32 %v791_v8, %v677_v53  ;;  %v300_v10 = vpop.f32.mrb[7].mxu1  ;;  %803 = vmatmul.mubr.msk.bf16.vlgmr.msra.gmra.mrb[16].mxu1 %vm378_vm1, %v363_v2  ;;  %v350_v12 = vmax.f32 %v306_v5, 0.0 }
 0x1e1   :  { %v301_v11 = vadd.f32 %v677_v53, %v300_v10  ;;  %837 = vmatpush3.bf16.msra.mxu1 %v526_v52  ;;  %v348_v14 = vmax.f32 %v298_v7, 0.0 }
 0x1e2   :  { %v351_v13 = vmax.f32 %v309_v9, 0.0 }
 0x1e3   :  { %v349_v15 = vmax.f32 %v301_v11, 0.0 }
 0x1e4   :  { %v365_v16 = vpack.c.bf16 %v351_v13, %v350_v12 }
 0x1e5   :  { %v364_v17 = vpack.c.bf16 %v349_v15, %v348_v14  ;;  %v794_v18 = vpop.f32.mrb[8].mxu1 }
 0x1e6   :  { %v322_v19 = vadd.f32 %v794_v18, %v677_v53  ;;  %v313_v20 = vpop.f32.mrb[9].mxu1 }
 0x1e7   :  { %v314_v21 = vadd.f32 %v677_v53, %v313_v20  ;;  %v795_v22 = vpop.f32.mrb[10].mxu1  ;;  %806 = vmatprep.mubr.msk.bf16.mxu1 %vm378_vm1, %v364_v17 }
 0x1e8   :  { %v325_v23 = vadd.f32 %v795_v22, %v677_v53  ;;  %v316_v24 = vpop.f32.mrb[11].mxu1  ;;  %807 = vmatmul.mubr.msk.bf16.gmra.mrb[20].mxu1 %vm378_vm1, %v365_v16  ;;  %v354_v26 = vmax.f32 %v322_v19, 0.0 }
 0x1e9   :  { %v317_v25 = vadd.f32 %v677_v53, %v316_v24  ;;  %v352_v28 = vmax.f32 %v314_v21, 0.0 }
 0x1ea   :  { %v355_v27 = vmax.f32 %v325_v23, 0.0 }
 0x1eb   :  { %v353_v29 = vmax.f32 %v317_v25, 0.0 }
 0x1ec   :  { %v367_v30 = vpack.c.bf16 %v355_v27, %v354_v26 }
 0x1ed   :  { %v366_v31 = vpack.c.bf16 %v353_v29, %v352_v28  ;;  %v798_v32 = vpop.f32.mrb[12].mxu1 }
 0x1ee   :  { %v338_v33 = vadd.f32 %v798_v32, %v677_v53  ;;  %v329_v34 = vpop.f32.mrb[13].mxu1 }
 0x1ef   :  { %v330_v35 = vadd.f32 %v677_v53, %v329_v34  ;;  %v799_v36 = vpop.f32.mrb[14].mxu1  ;;  %810 = vmatprep.mubr.msk.bf16.mxu1 %vm378_vm1, %v366_v31 }
 0x1f0   :  { %v341_v37 = vadd.f32 %v799_v36, %v677_v53  ;;  %v332_v38 = vpop.f32.mrb[15].mxu1  ;;  %811 = vmatmul.mubr.msk.bf16.gmra.mrb[24].mxu1 %vm378_vm1, %v367_v30  ;;  %v358_v40 = vmax.f32 %v338_v33, 0.0 }
 0x1f1   :  { %v333_v39 = vadd.f32 %v677_v53, %v332_v38  ;;  %v356_v42 = vmax.f32 %v330_v35, 0.0 }
 0x1f2   :  { %v359_v41 = vmax.f32 %v341_v37, 0.0 }
 0x1f3   :  { %v357_v43 = vmax.f32 %v333_v39, 0.0  ;;  %v695_v39 = vld [vmem:[%s1116_s8] ss:$0 sm:$0xff] }
 0x1f4   :  { %v369_v44 = vpack.c.bf16 %v359_v41, %v358_v40 }
 0x1f5   :  { %v368_v45 = vpack.c.bf16 %v357_v43, %v356_v42 }
 0x1f7   :  { %814 = vmatprep.mubr.msk.bf16.mxu1 %vm378_vm1, %v368_v45 }
 0x1f8   :  { %815 = vmatmul.mubr.msk.bf16.gmra.mrb[28].mxu1 %vm378_vm1, %v369_v44 }
 0x2b3   :  { %v804_v47 = vpop.f32.mrb[16].mxu1 }
 0x2b4   :  { %v446_v48 = vadd.f32 %v804_v47, %v686_v46  ;;  %v437_v49 = vpop.f32.mrb[17].mxu1 }
 0x2b5   :  { %v438_v50 = vadd.f32 %v686_v46, %v437_v49  ;;  %v805_v51 = vpop.f32.mrb[18].mxu1 }
 0x2b6   :  { %v449_v52 = vadd.f32 %v805_v51, %v686_v46  ;;  %v440_v53 = vpop.f32.mrb[19].mxu1  ;;  %v502_v55 = vmax.f32 %v446_v48, 0.0 }
 0x2b7   :  { %v441_v54 = vadd.f32 %v686_v46, %v440_v53  ;;  %v500_v57 = vmax.f32 %v438_v50, 0.0 }
 0x2b8   :  { %v503_v56 = vmax.f32 %v449_v52, 0.0 }
 0x2b9   :  { %v501_v58 = vmax.f32 %v441_v54, 0.0 }
 0x2ba   :  { %v519_v59 = vpack.c.bf16 %v503_v56, %v502_v55 }
 0x2bb   :  { %v518_v60 = vpack.c.bf16 %v501_v58, %v500_v57  ;;  %v808_v61 = vpop.f32.mrb[20].mxu1 }
 0x2bc   :  { %v462_v62 = vadd.f32 %v808_v61, %v686_v46  ;;  %v453_v63 = vpop.f32.mrb[21].mxu1 }
 0x2bd   :  { %v454_v0 = vadd.f32 %v686_v46, %v453_v63  ;;  %v809_v1 = vpop.f32.mrb[22].mxu1  ;;  %820 = vmatprep.mubr.msk.bf16.mxu0 %vm378_vm1, %v518_v60 }
 0x2be   :  { %v465_v2 = vadd.f32 %v809_v1, %v686_v46  ;;  %v456_v3 = vpop.f32.mrb[23].mxu1  ;;  %821 = vmatmul.mubr.msk.bf16.vlgmr.msra.gmra.mrb[16].mxu0 %vm378_vm1, %v519_v59  ;;  %v506_v5 = vmax.f32 %v462_v62, 0.0 }
 0x2bf   :  { %v457_v4 = vadd.f32 %v686_v46, %v456_v3  ;;  %v504_v7 = vmax.f32 %v454_v0, 0.0 }
 0x2c0   :  { %v507_v6 = vmax.f32 %v465_v2, 0.0 }
 0x2c1   :  { %v505_v8 = vmax.f32 %v457_v4, 0.0 }
 0x2c2   :  { %v521_v9 = vpack.c.bf16 %v507_v6, %v506_v5 }
 0x2c3   :  { %v520_v10 = vpack.c.bf16 %v505_v8, %v504_v7  ;;  %v812_v11 = vpop.f32.mrb[24].mxu1 }
 0x2c4   :  { %v478_v12 = vadd.f32 %v812_v11, %v686_v46  ;;  %v469_v13 = vpop.f32.mrb[25].mxu1 }
 0x2c5   :  { %v470_v14 = vadd.f32 %v686_v46, %v469_v13  ;;  %v813_v15 = vpop.f32.mrb[26].mxu1  ;;  %824 = vmatprep.mubr.msk.bf16.mxu0 %vm378_vm1, %v520_v10 }
 0x2c6   :  { %v481_v16 = vadd.f32 %v813_v15, %v686_v46  ;;  %v472_v17 = vpop.f32.mrb[27].mxu1  ;;  %825 = vmatmul.mubr.msk.bf16.gmra.mrb[20].mxu0 %vm378_vm1, %v521_v9  ;;  %v510_v19 = vmax.f32 %v478_v12, 0.0 }
 0x2c7   :  { %v473_v18 = vadd.f32 %v686_v46, %v472_v17  ;;  %v508_v21 = vmax.f32 %v470_v14, 0.0 }
 0x2c8   :  { %v511_v20 = vmax.f32 %v481_v16, 0.0 }
 0x2c9   :  { %v509_v22 = vmax.f32 %v473_v18, 0.0 }
 0x2ca   :  { %v523_v23 = vpack.c.bf16 %v511_v20, %v510_v19 }
 0x2cb   :  { %v522_v24 = vpack.c.bf16 %v509_v22, %v508_v21  ;;  %v816_v25 = vpop.f32.mrb[28].mxu1 }
 0x2cc   :  { %v494_v26 = vadd.f32 %v816_v25, %v686_v46  ;;  %v485_v27 = vpop.f32.mrb[29].mxu1 }
 0x2cd   :  { %v486_v28 = vadd.f32 %v686_v46, %v485_v27  ;;  %v817_v29 = vpop.f32.mrb[30].mxu1  ;;  %828 = vmatprep.mubr.msk.bf16.mxu0 %vm378_vm1, %v522_v24 }
 0x2ce   :  { %v497_v30 = vadd.f32 %v817_v29, %v686_v46  ;;  %v488_v31 = vpop.f32.mrb[31].mxu1  ;;  %829 = vmatmul.mubr.msk.bf16.gmra.mrb[24].mxu0 %vm378_vm1, %v523_v23  ;;  %v514_v33 = vmax.f32 %v494_v26, 0.0 }
 0x2cf   :  { %v489_v32 = vadd.f32 %v686_v46, %v488_v31  ;;  %v512_v35 = vmax.f32 %v486_v28, 0.0 }
 0x2d0   :  { %v515_v34 = vmax.f32 %v497_v30, 0.0 }
 0x2d1   :  { %v513_v36 = vmax.f32 %v489_v32, 0.0 }
 0x2d2   :  { %v525_v37 = vpack.c.bf16 %v515_v34, %v514_v33 }
 0x2d3   :  { %v524_v38 = vpack.c.bf16 %v513_v36, %v512_v35 }
 0x2d5   :  { %832 = vmatprep.mubr.msk.bf16.mxu1 %vm378_vm1, %v524_v38 }
 0x2d6   :  { %833 = vmatmul.mubr.msk.bf16.vlgmr.msra.gmra.mrb[32].mxu1 %vm378_vm1, %v525_v37 }
 0x391   :  { %v822_v40 = vpop.f32.mrb[16].mxu0 }
 0x392   :  { %v601_v41 = vadd.f32 %v822_v40, %v695_v39  ;;  %v592_v42 = vpop.f32.mrb[17].mxu0 }
 0x393   :  { %v593_v43 = vadd.f32 %v695_v39, %v592_v42  ;;  %v823_v44 = vpop.f32.mrb[18].mxu0 }
 0x394   :  { %658 = vst.msk [vmem:[%s1117_s9 + $0x10] sm:$0xff] %vm655_vm2, %v601_v41  ;;  %v604_v45 = vadd.f32 %v823_v44, %v695_v39  ;;  %v595_v46 = vpop.f32.mrb[19].mxu0 }
 0x395   :  { %656 = vst.msk [vmem:[%s1117_s9] sm:$0xff] %vm655_vm2, %v593_v43  ;;  %v596_v47 = vadd.f32 %v695_v39, %v595_v46 }
 0x396   :  { %659 = vst.msk [vmem:[%s1117_s9 + $0x18] sm:$0xff] %vm655_vm2, %v604_v45 }
 0x397   :  { %657 = vst.msk [vmem:[%s1117_s9 + $0x8] sm:$0xff] %vm655_vm2, %v596_v47 }
 0x399   :  { %v826_v48 = vpop.f32.mrb[20].mxu0 }
 0x39a   :  { %v617_v49 = vadd.f32 %v826_v48, %v695_v39  ;;  %v608_v50 = vpop.f32.mrb[21].mxu0 }
 0x39b   :  { %v609_v51 = vadd.f32 %v695_v39, %v608_v50  ;;  %v827_v52 = vpop.f32.mrb[22].mxu0 }
 0x39c   :  { %662 = vst.msk [vmem:[%s1117_s9 + $0x30] sm:$0xff] %vm655_vm2, %v617_v49  ;;  %v620_v53 = vadd.f32 %v827_v52, %v695_v39  ;;  %v611_v54 = vpop.f32.mrb[23].mxu0 }
 0x39d   :  { %660 = vst.msk [vmem:[%s1117_s9 + $0x20] sm:$0xff] %vm655_vm2, %v609_v51  ;;  %v612_v55 = vadd.f32 %v695_v39, %v611_v54 }
 0x39e   :  { %663 = vst.msk [vmem:[%s1117_s9 + $0x38] sm:$0xff] %vm655_vm2, %v620_v53 }
 0x39f   :  { %661 = vst.msk [vmem:[%s1117_s9 + $0x28] sm:$0xff] %vm655_vm2, %v612_v55 }
 0x3a1   :  { %v830_v56 = vpop.f32.mrb[24].mxu0 }
 0x3a2   :  { %v633_v57 = vadd.f32 %v830_v56, %v695_v39  ;;  %v624_v58 = vpop.f32.mrb[25].mxu0 }
 0x3a3   :  { %v625_v59 = vadd.f32 %v695_v39, %v624_v58  ;;  %v831_v60 = vpop.f32.mrb[26].mxu0 }
 0x3a4   :  { %666 = vst.msk [vmem:[%s1117_s9 + $0x50] sm:$0xff] %vm655_vm2, %v633_v57  ;;  %v636_v61 = vadd.f32 %v831_v60, %v695_v39  ;;  %v627_v62 = vpop.f32.mrb[27].mxu0 }
 0x3a5   :  { %664 = vst.msk [vmem:[%s1117_s9 + $0x40] sm:$0xff] %vm655_vm2, %v625_v59  ;;  %v628_v63 = vadd.f32 %v695_v39, %v627_v62 }
 0x3a6   :  { %667 = vst.msk [vmem:[%s1117_s9 + $0x58] sm:$0xff] %vm655_vm2, %v636_v61 }
 0x3a7   :  { %665 = vst.msk [vmem:[%s1117_s9 + $0x48] sm:$0xff] %vm655_vm2, %v628_v63 }
 0x3a9   :  { %v834_v0 = vpop.f32.mrb[32].mxu1 }
 0x3aa   :  { %v649_v1 = vadd.f32 %v834_v0, %v695_v39  ;;  %v640_v2 = vpop.f32.mrb[33].mxu1 }
 0x3ab   :  { %v641_v3 = vadd.f32 %v695_v39, %v640_v2  ;;  %v835_v4 = vpop.f32.mrb[34].mxu1 }
 0x3ac   :  { %670 = vst.msk [vmem:[%s1117_s9 + $0x70] sm:$0xff] %vm655_vm2, %v649_v1  ;;  %v652_v5 = vadd.f32 %v835_v4, %v695_v39  ;;  %v643_v6 = vpop.f32.mrb[35].mxu1 }
 0x3ad   :  { %668 = vst.msk [vmem:[%s1117_s9 + $0x60] sm:$0xff] %vm655_vm2, %v641_v3  ;;  %v644_v7 = vadd.f32 %v695_v39, %v643_v6 }
 0x3ae   :  { %671 = vst.msk [vmem:[%s1117_s9 + $0x78] sm:$0xff] %vm655_vm2, %v652_v5 }
 0x3af   :  { %669 = vst.msk [vmem:[%s1117_s9 + $0x68] sm:$0xff] %vm655_vm2, %v644_v7 }

// kernel: diffpp_forward.3
= control target key start
LH: loop header
LB: loop body
LE: loop exit
PB: predicated region body
PF: predicated region fallthrough
CT: control target
= control target key end

     0   :  { %v379_v0 = vmov 0.0   ;;  %vm380_vm0 = vmmov 0   ;;  %vm130_vm1 = vcmask 523264   ;;  %vm191_vm2 = vcmask 261120   ;;  %s579_s1 = inlined_call_operand.vmem [shape: f32[128,64], index: 1, kind: input, shape index: {}]   ;;  %s580_s3 = inlined_call_operand.vmem [shape: f32[64,32], index: 3, kind: input, shape index: {}]   ;;  %s581_s0 = inlined_call_operand.vmem [shape: f32[16,128], index: 0, kind: input, shape index: {}]   ;;  %s582_s2 = inlined_call_operand.vmem [shape: f32[1,64], index: 2, kind: input, shape index: {}]   ;;  %s583_s5 = inlined_call_operand.vmem [shape: f32[32,32], index: 5, kind: input, shape index: {}]   ;;  %s584_s4 = inlined_call_operand.vmem [shape: f32[1,32], index: 4, kind: input, shape index: {}]   ;;  %s585_s7 = inlined_call_operand.vmem [shape: f32[32,32], index: 7, kind: input, shape index: {}]   ;;  %s586_s6 = inlined_call_operand.vmem [shape: f32[1,32], index: 6, kind: input, shape index: {}]   ;;  %s587_s8 = inlined_call_operand.vmem [shape: f32[1,32], index: 8, kind: input, shape index: {}]   ;;  %s588_s9 = inlined_call_operand.vmem [shape: f32[16,32], index: 9, kind: output, shape index: {}]  }
   0x1   :  { %329 = vmatprep.subr.bf16.mxu0 %v379_v0  ;;  %v35_v1 = vld [vmem:[%s579_s1] sm:$0xff]  ;;  %v36_v2 = vld [vmem:[%s579_s1 + $0x8] sm:$0xff]  ;;  %v37_v3 = vld [vmem:[%s579_s1 + $0x10] sm:$0xff]  ;;  %345 = vmatprep.mubr.msk.bf16.mxu0 %vm380_vm0, %v379_v0 }
   0x2   :  { %v52_v4 = vpack.c.bf16 %v36_v2, %v35_v1  ;;  %v38_v5 = vld [vmem:[%s579_s1 + $0x18] sm:$0xff]  ;;  %349 = vmatprep.subr.bf16.mxu1 %v379_v0  ;;  %357 = vmatprep.mubr.msk.bf16.mxu1 %vm380_vm0, %v379_v0  ;;  %v39_v7 = vld [vmem:[%s579_s1 + $0x20] sm:$0xff]  ;;  %v40_v8 = vld [vmem:[%s579_s1 + $0x28] sm:$0xff] }
   0x3   :  { %v53_v6 = vpack.c.bf16 %v38_v5, %v37_v3  ;;  %v110_v9 = vld [vmem:[%s580_s3] sm:$0xff]  ;;  %v111_v10 = vld [vmem:[%s580_s3 + $0x8] sm:$0xff]  ;;  %v112_v11 = vld [vmem:[%s580_s3 + $0x10] sm:$0xff]  ;;  %v54_v12 = vpack.c.bf16 %v40_v8, %v39_v7 }
   0x4   :  { %330 = vmatpush3.bf16.msra.mxu0 %v52_v4  ;;  %v119_v13 = vpack.c.bf16 %v111_v10, %v110_v9  ;;  %v113_v14 = vld [vmem:[%s580_s3 + $0x18] sm:$0xff]  ;;  %v41_v15 = vld [vmem:[%s579_s1 + $0x30] sm:$0xff]  ;;  %v43_v19 = vld [vmem:[%s579_s1 + $0x40] sm:$0xff] }
   0x5   :  { %331 = vmatprep.subr.bf16.mxu0 %v379_v0  ;;  %v42_v16 = vld [vmem:[%s579_s1 + $0x38] sm:$0xff]  ;;  %v120_v17 = vpack.c.bf16 %v113_v14, %v112_v11  ;;  %v44_v20 = vld [vmem:[%s579_s1 + $0x48] sm:$0xff]  ;;  %v45_v22 = vld [vmem:[%s579_s1 + $0x50] sm:$0xff] }
   0x6   :  { %350 = vmatpush3.bf16.msra.mxu1 %v119_v13  ;;  %v55_v18 = vpack.c.bf16 %v42_v16, %v41_v15  ;;  %v56_v21 = vpack.c.bf16 %v44_v20, %v43_v19  ;;  %v46_v23 = vld [vmem:[%s579_s1 + $0x58] sm:$0xff]  ;;  %v47_v25 = vld [vmem:[%s579_s1 + $0x60] sm:$0xff]  ;;  %v48_v26 = vld [vmem:[%s579_s1 + $0x68] sm:$0xff] }
   0x7   :  { %351 = vmatprep.subr.bf16.mxu1 %v379_v0  ;;  %v57_v24 = vpack.c.bf16 %v46_v23, %v45_v22  ;;  %v58_v27 = vpack.c.bf16 %v48_v26, %v47_v25  ;;  %v49_v28 = vld [vmem:[%s579_s1 + $0x70] sm:$0xff]  ;;  %v50_v29 = vld [vmem:[%s579_s1 + $0x78] sm:$0xff]  ;;  %v33_v31 = vld [vmem:[%s581_s0] sm:$0xff] }
   0x8   :  { %332 = vmatpush3.bf16.msra.mxu0 %v53_v6  ;;  %v59_v30 = vpack.c.bf16 %v50_v29, %v49_v28  ;;  %v34_v32 = vld [vmem:[%s581_s0 + $0x8] sm:$0xff]  ;;  %v114_v34 = vld [vmem:[%s580_s3 + $0x20] sm:$0xff]  ;;  %v116_v37 = vld [vmem:[%s580_s3 + $0x30] sm:$0xff] }
   0x9   :  { %333 = vmatprep.subr.bf16.mxu0 %v379_v0  ;;  %v51_v33 = vpack.c.bf16 %v34_v32, %v33_v31  ;;  %v115_v35 = vld [vmem:[%s580_s3 + $0x28] sm:$0xff]  ;;  %v117_v38 = vld [vmem:[%s580_s3 + $0x38] sm:$0xff]  ;;  %v302_v40 = vld [vmem:[%s582_s2] ss:$0 sm:$0xff] }
   0xa   :  { %352 = vmatpush3.bf16.msra.mxu1 %v120_v17  ;;  %v121_v36 = vpack.c.bf16 %v115_v35, %v114_v34  ;;  %v122_v39 = vpack.c.bf16 %v117_v38, %v116_v37  ;;  %v177_v50 = vld [vmem:[%s583_s5] sm:$0xff]  ;;  %v178_v51 = vld [vmem:[%s583_s5 + $0x8] sm:$0xff]  ;;  %v179_v53 = vld [vmem:[%s583_s5 + $0x10] sm:$0xff] }
   0xb   :  { %353 = vmatprep.subr.bf16.mxu1 %v379_v0  ;;  %v182_v52 = vpack.c.bf16 %v178_v51, %v177_v50  ;;  %v180_v54 = vld [vmem:[%s583_s5 + $0x18] sm:$0xff]  ;;  %v303_v56 = vld [vmem:[%s584_s4] ss:$0 sm:$0xff]  ;;  %v239_v4 = vld [vmem:[%s585_s7 + $0x8] sm:$0xff] }
   0xc   :  { %334 = vmatpush3.bf16.msra.mxu0 %v54_v12  ;;  %v183_v55 = vpack.c.bf16 %v180_v54, %v179_v53  ;;  %v238_v3 = vld [vmem:[%s585_s7] sm:$0xff]  ;;  %v240_v6 = vld [vmem:[%s585_s7 + $0x10] sm:$0xff]  ;;  %v241_v7 = vld [vmem:[%s585_s7 + $0x18] sm:$0xff] }
   0xd   :  { %335 = vmatprep.subr.bf16.mxu0 %v379_v0  ;;  %v243_v5 = vpack.c.bf16 %v239_v4, %v238_v3  ;;  %v244_v8 = vpack.c.bf16 %v241_v7, %v240_v6  ;;  %v305_v9 = vld [vmem:[%s586_s6] ss:$0 sm:$0xff] }
   0xe   :  { %354 = vmatpush3.bf16.msra.mxu1 %v121_v36 }
   0xf   :  { %355 = vmatprep.subr.bf16.mxu1 %v379_v0 }
  0x10   :  { %336 = vmatpush3.bf16.msra.mxu0 %v55_v18  ;;  %v307_v18 = vld [vmem:[%s587_s8] ss:$0 sm:$0xff] }
  0x11   :  { %337 = vmatprep.subr.bf16.mxu0 %v379_v0 }
  0x12   :  { %356 = vmatpush3.bf16.msra.mxu1 %v122_v39 }
  0x13   :  { %361 = vmatprep.subr.bf16.mxu1 %v379_v0 }
  0x14   :  { %338 = vmatpush3.bf16.msra.mxu0 %v56_v21 }
  0x15   :  { %339 = vmatprep.subr.bf16.mxu0 %v379_v0 }
  0x18   :  { %340 = vmatpush3.bf16.msra.mxu0 %v57_v24 }
  0x19   :  { %341 = vmatprep.subr.bf16.mxu0 %v379_v0 }
  0x1c   :  { %342 = vmatpush3.bf16.msra.mxu0 %v58_v27 }
  0x1d   :  { %343 = vmatprep.subr.bf16.mxu0 %v379_v0 }
  0x20   :  { %344 = vmatpush3.bf16.msra.mxu0 %v59_v30 }
  0x23   :  { %346 = vmatmul.mubr.bf16.vlgmr.msra.gmra.mrb[0].mxu0 %v51_v33 }
  0xf6   :  { %v101_v41 = vpop.f32.mrb[0].mxu0 }
  0xf7   :  { %v102_v42 = vadd.f32 %v302_v40, %v101_v41  ;;  %v347_v43 = vpop.f32.mrb[1].mxu0 }
  0xf8   :  { %v104_v44 = vpop.f32.mrb[2].mxu0 }
  0xf9   :  { %v105_v45 = vadd.f32 %v302_v40, %v104_v44  ;;  %v348_v46 = vpop.f32.mrb[3].mxu0  ;;  %v108_v47 = vmax.f32 %v102_v42, 0.0 }
  0xfb   :  { %v109_v48 = vmax.f32 %v105_v45, 0.0 }
  0xfd   :  { %v118_v49 = vpack.c.bf16 %v109_v48, %v108_v47 }
  0xff   :  { %358 = vmatmul.mubr.msk.bf16.vlgmr.msra.gmra.mrb[0].mxu1 %vm130_vm1, %v118_v49 }
 0x100   :  { %365 = vmatprep.mubr.msk.bf16.mxu1 %vm380_vm0, %v379_v0  ;;  %362 = vmatpush3.bf16.msra.mxu1 %v182_v52 }
 0x101   :  { %363 = vmatprep.subr.bf16.mxu1 %v379_v0 }
 0x104   :  { %364 = vmatpush3.bf16.msra.mxu1 %v183_v55 }
 0x105   :  { %369 = vmatprep.subr.bf16.mxu1 %v379_v0 }
 0x1d2   :  { %v168_v57 = vpop.f32.mrb[0].mxu1 }
 0x1d3   :  { %v169_v58 = vadd.f32 %v303_v56, %v168_v57  ;;  %v359_v59 = vpop.f32.mrb[1].mxu1 }
 0x1d4   :  { %v171_v60 = vpop.f32.mrb[2].mxu1 }
 0x1d5   :  { %v172_v61 = vadd.f32 %v303_v56, %v171_v60  ;;  %v360_v62 = vpop.f32.mrb[3].mxu1  ;;  %v175_v63 = vmax.f32 %v169_v58, 0.0 }
 0x1d7   :  { %v176_v1 = vmax.f32 %v172_v61, 0.0 }
 0x1d9   :  { %v181_v2 = vpack.c.bf16 %v176_v1, %v175_v63 }
 0x1db   :  { %366 = vmatmul.mubr.msk.bf16.vlgmr.msra.gmra.mrb[4].mxu1 %vm191_vm2, %v181_v2 }
 0x1dc   :  { %373 = vmatprep.mubr.msk.bf16.mxu1 %vm380_vm0, %v379_v0  ;;  %370 = vmatpush3.bf16.msra.mxu1 %v243_v5 }
 0x1dd   :  { %371 = vmatprep.subr.bf16.mxu1 %v379_v0 }
 0x1e0   :  { %372 = vmatpush3.bf16.msra.mxu1 %v244_v8 }
 0x2ae   :  { %v229_v10 = vpop.f32.mrb[4].mxu1 }
 0x2af   :  { %v230_v11 = vadd.f32 %v305_v9, %v229_v10  ;;  %v367_v12 = vpop.f32.mrb[5].mxu1 }
 0x2b0   :  { %v232_v13 = vpop.f32.mrb[6].mxu1 }
 0x2b1   :  { %v233_v14 = vadd.f32 %v305_v9, %v232_v13  ;;  %v368_v0 = vpop.f32.mrb[7].mxu1  ;;  %v236_v15 = vmax.f32 %v230_v11, 0.0 }
 0x2b3   :  { %v237_v16 = vmax.f32 %v233_v14, 0.0 }
 0x2b5   :  { %v242_v17 = vpack.c.bf16 %v237_v16, %v236_v15 }
 0x2b7   :  { %374 = vmatmul.mubr.msk.bf16.vlgmr.msra.gmra.mrb[8].mxu1 %vm191_vm2, %v242_v17 }
 0x38a   :  { %v289_v19 = vpop.f32.mrb[8].mxu1 }
 0x38b   :  { %v290_v20 = vadd.f32 %v307_v18, %v289_v19  ;;  %v375_v21 = vpop.f32.mrb[9].mxu1 }
 0x38c   :  { %v292_v22 = vpop.f32.mrb[10].mxu1 }
 0x38d   :  { %296 = vst.msk [vmem:[%s588_s9] sm:$0xff] %vm191_vm2, %v290_v20  ;;  %v293_v23 = vadd.f32 %v307_v18, %v292_v22  ;;  %v376_v24 = vpop.f32.mrb[11].mxu1 }
 0x38f   :  { %297 = vst.msk [vmem:[%s588_s9 + $0x8] sm:$0xff] %vm191_vm2, %v293_v23 }

// kernel: diffpp_forward.5
= control target key start
LH: loop header
LB: loop body
LE: loop exit
PB: predicated region body
PF: predicated region fallthrough
CT: control target
= control target key end

     0   :  { %v2117_v0 = vmov 0.0   ;;  %vm2118_vm0 = vmmov 0   ;;  %vm137_vm1 = vcmask 261120   ;;  %s2120_s26 = smov 96   ;;  %s2121_s27 = smov 88   ;;  %vm185_vm2 = vcmask 64512   ;;  %s2583_s2 = inlined_call_operand.vmem [shape: f32[128,32], index: 2, kind: input, shape index: {}]   ;;  %s2584_s0 = inlined_call_operand.vmem [shape: f32[16,128], index: 0, kind: input, shape index: {}]   ;;  %s2585_s4 = inlined_call_operand.vmem [shape: f32[32,96], index: 4, kind: input, shape index: {}]   ;;  %s2586_s3 = inlined_call_operand.vmem [shape: f32[1,32], index: 3, kind: input, shape index: {}]   ;;  %s2587_s5 = inlined_call_operand.vmem [shape: f32[1,96], index: 5, kind: input, shape index: {}]   ;;  %s2588_s1 = inlined_call_operand.vmem [shape: f32[2,4,8,8], index: 1, kind: input, shape index: {}]   ;;  %s2589_s6 = inlined_call_operand.vmem [shape: f32[32,32], index: 6, kind: input, shape index: {}]   ;;  %s2590_s8 = inlined_call_operand.vmem [shape: f32[32,64], index: 8, kind: input, shape index: {}]   ;;  %s2591_s10 = inlined_call_operand.vmem [shape: f32[64,32], index: 10, kind: input, shape index: {}]   ;;  %s2592_s7 = inlined_call_operand.vmem [shape: f32[1,32], index: 7, kind: input, shape index: {}]   ;;  %s2593_s9 = inlined_call_operand.vmem [shape: f32[1,64], index: 9, kind: input, shape index: {}]   ;;  %s2594_s12 = inlined_call_operand.vmem [shape: f32[32,28], index: 12, kind: input, shape index: {}]   ;;  %s2595_s11 = inlined_call_operand.vmem [shape: f32[1,32], index: 11, kind: input, shape index: {}]   ;;  %s2596_s13 = inlined_call_operand.vmem [shape: f32[1,28], index: 13, kind: input, shape index: {}]   ;;  %s2597_s14 = inlined_call_operand.vmem [shape: f32[16,28], index: 14, kind: output, shape index: {}]  }
   0x1   :  { %1925 = vmatprep.subr.bf16.mxu0 %v2117_v0  ;;  %v50_v1 = vld [vmem:[%s2583_s2] sm:$0xff]  ;;  %v51_v2 = vld [vmem:[%s2583_s2 + $0x8] sm:$0xff]  ;;  %v52_v3 = vld [vmem:[%s2583_s2 + $0x10] sm:$0xff]  ;;  %1941 = vmatprep.mubr.msk.bf16.mxu0 %vm2118_vm0, %v2117_v0  ;;  %s2122_s29 = smov 56   ;;  %s2123_s30 = smov 80   ;;  %vm524_vm3 = vcmask 130112  }
   0x2   :  { %v67_v4 = vpack.c.bf16 %v51_v2, %v50_v1  ;;  %v53_v5 = vld [vmem:[%s2583_s2 + $0x18] sm:$0xff]  ;;  %1945 = vmatprep.subr.bf16.mxu1 %v2117_v0  ;;  %1949 = vmatprep.mubr.msk.bf16.mxu1 %vm2118_vm0, %v2117_v0  ;;  %v54_v7 = vld [vmem:[%s2583_s2 + $0x20] sm:$0xff]  ;;  %v55_v8 = vld [vmem:[%s2583_s2 + $0x28] sm:$0xff]  ;;  %s2124_s15 = smov 120   ;;  %s2125_s17 = smov 112   ;;  %vm699_vm4 = vcmask 195712  }
   0x3   :  { %v68_v6 = vpack.c.bf16 %v53_v5, %v52_v3  ;;  %v69_v9 = vpack.c.bf16 %v55_v8, %v54_v7  ;;  %v56_v10 = vld [vmem:[%s2583_s2 + $0x30] sm:$0xff]  ;;  %v57_v11 = vld [vmem:[%s2583_s2 + $0x38] sm:$0xff]  ;;  %v58_v13 = vld [vmem:[%s2583_s2 + $0x40] sm:$0xff]  ;;  %s2127_s20 = smov 72   ;;  %s2128_s21 = smov 104   ;;  %vm874_vm5 = vcmask 261312  }
   0x4   :  { %1926 = vmatpush3.bf16.msra.mxu0 %v67_v4  ;;  %v70_v12 = vpack.c.bf16 %v57_v11, %v56_v10  ;;  %v59_v14 = vld [vmem:[%s2583_s2 + $0x48] sm:$0xff]  ;;  %v60_v16 = vld [vmem:[%s2583_s2 + $0x50] sm:$0xff]  ;;  %v61_v17 = vld [vmem:[%s2583_s2 + $0x58] sm:$0xff]  ;;  %s2131_s16 = smov 16   ;;  %vm1704_vm6 = vcmask 523264   ;;  %vm1818_vm7 = vcmask 228352  }
   0x5   :  { %1927 = vmatprep.subr.bf16.mxu0 %v2117_v0  ;;  %v71_v15 = vpack.c.bf16 %v59_v14, %v58_v13  ;;  %v72_v18 = vpack.c.bf16 %v61_v17, %v60_v16  ;;  %v62_v19 = vld [vmem:[%s2583_s2 + $0x60] sm:$0xff]  ;;  %v63_v20 = vld [vmem:[%s2583_s2 + $0x68] sm:$0xff]  ;;  %v64_v22 = vld [vmem:[%s2583_s2 + $0x70] sm:$0xff] }
   0x6   :  { %v73_v21 = vpack.c.bf16 %v63_v20, %v62_v19  ;;  %v65_v23 = vld [vmem:[%s2583_s2 + $0x78] sm:$0xff]  ;;  %v48_v25 = vld [vmem:[%s2584_s0] sm:$0xff]  ;;  %v49_v26 = vld [vmem:[%s2584_s0 + $0x8] sm:$0xff]  ;;  %s2126_s0 = smov 48  }
   0x7   :  { %v74_v24 = vpack.c.bf16 %v65_v23, %v64_v22  ;;  %v66_v27 = vpack.c.bf16 %v49_v26, %v48_v25  ;;  %v123_v28 = vld [vmem:[%s2585_s4] sm:$0xff]  ;;  %v124_v29 = vld [vmem:[%s2585_s4 + $0x8] sm:$0xff]  ;;  %v125_v31 = vld [vmem:[%s2585_s4 + $0x10] sm:$0xff] }
   0x8   :  { %1928 = vmatpush3.bf16.msra.mxu0 %v68_v6  ;;  %v128_v30 = vpack.c.bf16 %v124_v29, %v123_v28  ;;  %v126_v32 = vld [vmem:[%s2585_s4 + $0x18] sm:$0xff]  ;;  %v1825_v34 = vld [vmem:[%s2586_s3] ss:$0 sm:$0xff]  ;;  %s2119_s3 = smov 64   ;;  %v1833_v8 = vld [vmem:[%s2588_s1 + $0x8] sm:$0xff] }
   0x9   :  { %1929 = vmatprep.subr.bf16.mxu0 %v2117_v0  ;;  %v129_v33 = vpack.c.bf16 %v126_v32, %v125_v31  ;;  %v1826_v42 = vld [vmem:[%s2587_s5] ss:$0 sm:$0xff]  ;;  %v1837_v26 = vld [vmem:[%s2588_s1 + $0x10] sm:$0xff] }
   0xa   :  { %1946 = vmatpush3.bf16.msra.mxu1 %v128_v30  ;;  %v261_v52 = vld [vmem:[%s2588_s1] sm:$0xff] }
   0xb   :  { %1947 = vmatprep.subr.bf16.mxu1 %v2117_v0 }
   0xc   :  { %1930 = vmatpush3.bf16.msra.mxu0 %v69_v9 }
   0xd   :  { %1931 = vmatprep.subr.bf16.mxu0 %v2117_v0 }
   0xe   :  { %1948 = vmatpush3.bf16.msra.mxu1 %v129_v33 }
   0xf   :  { %1953 = vmatprep.subr.mxu1 %v2117_v0 }
  0x10   :  { %1932 = vmatpush3.bf16.msra.mxu0 %v70_v12 }
  0x11   :  { %1933 = vmatprep.subr.bf16.mxu0 %v2117_v0 }
  0x14   :  { %1934 = vmatpush3.bf16.msra.mxu0 %v71_v15 }
  0x15   :  { %1935 = vmatprep.subr.bf16.mxu0 %v2117_v0 }
  0x18   :  { %1936 = vmatpush3.bf16.msra.mxu0 %v72_v18 }
  0x19   :  { %1937 = vmatprep.subr.bf16.mxu0 %v2117_v0 }
  0x1c   :  { %1938 = vmatpush3.bf16.msra.mxu0 %v73_v21 }
  0x1d   :  { %1939 = vmatprep.subr.bf16.mxu0 %v2117_v0 }
  0x20   :  { %1940 = vmatpush3.bf16.msra.mxu0 %v74_v24 }
  0x21   :  { %1993 = vmatprep.subr.mxu0 %v2117_v0 }
  0x23   :  { %1942 = vmatmul.mubr.bf16.vlgmr.msra.gmra.mrb[0].mxu0 %v66_v27 }
  0x24   :  { %1995 = vmatprep.mubr.msk.f32.mxu0 %vm2118_vm0, %v2117_v0 }
  0xf6   :  { %v116_v35 = vpop.f32.mrb[0].mxu0 }
  0xf7   :  { %v1943_v36 = vpop.f32.mrb[1].mxu0  ;;  %v2295_v38 = vadd.f32 %v1825_v34, %v116_v35 }
  0xf8   :  { %v119_v37 = vpop.f32.mrb[2].mxu0 }
  0xf9   :  { %v2297_v39 = vadd.f32 %v1825_v34, %v119_v37  ;;  %v1944_v40 = vpop.f32.mrb[3].mxu0 }
  0xfb   :  { %v127_v41 = vpack.c.bf16 %v2297_v39, %v2295_v38 }
  0xfd   :  { %1950 = vmatmul.mubr.msk.bf16.vlgmr.msra.gmra.mrb[0].mxu1 %vm137_vm1, %v127_v41 }
  0xfe   :  { %1955 = vmatprep.mubr.msk.f32.mxu1 %vm2118_vm0, %v2117_v0 }
 0x1d0   :  { %v175_v43 = vpop.f32.mrb[0].mxu1 }
 0x1d1   :  { %v2307_v44 = vadd.f32 %v1826_v42, %v175_v43  ;;  %v1951_v45 = vpop.f32.mrb[1].mxu1 }
 0x1d2   :  { %v178_v46 = vpop.f32.mrb[2].mxu1 }
 0x1d3   :  { %v2309_v47 = vadd.f32 %v1826_v42, %v178_v46  ;;  %274 = vrot.lane.b32.xlu1 %v2307_v44, %s2119_s3  ;;  %183 = vrot.lane.b32.xlu0 %v2307_v44, %s2120_s26  ;;  %v1952_v48 = vpop.f32.mrb[3].mxu1 }
 0x1d7   :  { %353 = vrot.lane.b32.xlu1 %v2307_v44, %s2121_s27 }
 0x245   :  { %v184_v49 = vpop.permute.xlu0 %183  ;;  %v275_v50 = vpop.permute.xlu1 %274 }
 0x246   :  { %1954 = vmatpush3.xpose.msk.msra.mxu1 %vm185_vm2, %v184_v49 }
 0x247   :  { %1958 = vmatprep.subr.mxu1 %v2117_v0 }
 0x249   :  { %1956 = vmatmul.mubr.msk.f32.vlgmr.msra.gmra.mrb[4].mxu1 %vm185_vm2, %v2307_v44  ;;  %v354_v62 = vpop.permute.xlu1 %353 }
 0x24a   :  { %1959 = vmatpush3.msra.mxu1 %v275_v50  ;;  %1960 = vmatprep.mubr.msk.f32.mxu1 %vm2118_vm0, %v2117_v0 }
 0x24b   :  { %1963 = vmatprep.subr.mxu1 %v2117_v0 }
 0x31c   :  { %v256_v51 = vpop.f32.mrb[4].mxu1 }
 0x31d   :  { %v260_v53 = vmul.f32 0.35355338, %v256_v51  ;;  %v1957_v54 = vpop.f32.mrb[5].mxu1 }
 0x31e   :  { %v1845_v54 = vld [vmem:[%s2588_s1 + $0x20] sm:$0xff] }
 0x31f   :  { %v262_v55 = vadd.f32 %v261_v52, %v260_v53 }
 0x321   :  { %v263_v56 = vsel %vm185_vm2, %v262_v55, -inf }
 0x322   :  { %264 = vmax.xlane.f32.xlu0 %v263_v56 }
 0x338   :  { %444 = vrot.lane.b32.xlu0 %v2307_v44, %s2122_s29 }
 0x33c   :  { %528 = vrot.lane.b32.xlu0 %v2307_v44, %s2123_s30 }
 0x3af   :  { %v265_v57 = vpop.xlane.xlu0 %264 }
 0x3b0   :  { %v266_v58 = vsub.f32 %v262_v55, %v265_v57 }
 0x3b2   :  { %v267_v59 = vmul.f32 1.442695, %v266_v58 }
 0x3b3   :  { %v445_v4 = vpop.permute.xlu0 %444 }
 0x3b4   :  { %2085 = vpow2.f32 %v267_v59 }
 0x3b7   :  { %v529_v18 = vpop.permute.xlu0 %528 }
 0x3be   :  { %v2086_v60 = vpop.eup %2085 }
 0x3bf   :  { %v269_v61 = vsel %vm185_vm2, %v2086_v60, 0.0 }
 0x3c0   :  { %270 = vadd.xlane.f32.xlu1 %v269_v61 }
 0x3d1   :  { %351 = vrot.lane.b32.xlu1 %v2307_v44, %s2124_s15 }
 0x44d   :  { %v271_v63 = vpop.xlane.xlu1 %270 }
 0x44e   :  { %2087 = vrcp.f32 %v271_v63 }
 0x451   :  { %v352_v3 = vpop.permute.xlu1 %351 }
 0x458   :  { %v2088_v1 = vpop.eup %2087 }
 0x459   :  { %v273_v2 = vmul.f32 %v2088_v1, %v2086_v60  ;;  %v1849_v60 = vld [vmem:[%s2588_s1 + $0x28] sm:$0xff] }
 0x45b   :  { %1961 = vmatmul.mubr.msk.f32.vlgmr.msra.gmra.mrb[6].mxu1 %vm185_vm2, %v273_v2 }
 0x45c   :  { %1964 = vmatpush3.xpose.msk.msra.mxu1 %vm185_vm2, %v354_v62  ;;  %1965 = vmatprep.mubr.msk.f32.mxu1 %vm2118_vm0, %v2117_v0 }
 0x45d   :  { %1968 = vmatprep.subr.mxu1 %v2117_v0 }
 0x45f   :  { %1966 = vmatmul.mubr.msk.f32.vlgmr.msra.gmra.mrb[8].mxu1 %vm185_vm2, %v352_v3 }
 0x460   :  { %1969 = vmatpush3.msra.mxu1 %v445_v4  ;;  %1970 = vmatprep.mubr.msk.f32.mxu1 %vm2118_vm0, %v2117_v0 }
 0x461   :  { %1973 = vmatprep.subr.mxu1 %v2117_v0 }
 0x52e   :  { %v346_v5 = vpop.f32.mrb[6].mxu1 }
 0x52f   :  { %350 = vst.msk [vmem:[#allocation2] sm:$0xff] %vm185_vm2, %v346_v5  ;;  %v1962_v6 = vpop.f32.mrb[7].mxu1 }
 0x532   :  { %v425_v7 = vpop.f32.mrb[8].mxu1 }
 0x533   :  { %v429_v9 = vmul.f32 0.35355338, %v425_v7  ;;  %v1967_v10 = vpop.f32.mrb[9].mxu1 }
 0x535   :  { %v432_v11 = vadd.f32 %v1833_v8, %v429_v9  ;;  %v1857_v8 = vld [vmem:[%s2588_s1 + $0x38] sm:$0xff] }
 0x537   :  { %v433_v12 = vsel %vm185_vm2, %v432_v11, -inf }
 0x538   :  { %434 = vmax.xlane.f32.xlu1 %v433_v12 }
 0x5c5   :  { %v435_v13 = vpop.xlane.xlu1 %434 }
 0x5c6   :  { %v436_v14 = vsub.f32 %v432_v11, %v435_v13 }
 0x5c8   :  { %v437_v15 = vmul.f32 1.442695, %v436_v14 }
 0x5ca   :  { %2089 = vpow2.f32 %v437_v15 }
 0x5d4   :  { %v2090_v16 = vpop.eup %2089 }
 0x5d5   :  { %v439_v17 = vsel %vm185_vm2, %v2090_v16, 0.0 }
 0x5d6   :  { %440 = vadd.xlane.f32.xlu0 %v439_v17 }
 0x5ec   :  { %526 = vrot.lane.b32.xlu0 %v2307_v44, %s2125_s17 }
 0x663   :  { %v441_v19 = vpop.xlane.xlu0 %440 }
 0x664   :  { %2091 = vrcp.f32 %v441_v19 }
 0x667   :  { %v527_v22 = vpop.permute.xlu0 %526 }
 0x66e   :  { %v2092_v20 = vpop.eup %2091 }
 0x66f   :  { %v443_v21 = vmul.f32 %v2092_v20, %v2090_v16  ;;  %v1841_v16 = vld [vmem:[%s2588_s1 + $0x18] sm:$0xff]  ;;  %v1853_v20 = vld [vmem:[%s2588_s1 + $0x30] sm:$0xff]  ;;  %s2129_s1 = smov 40  }
 0x671   :  { %1971 = vmatmul.mubr.msk.f32.vlgmr.msra.gmra.mrb[10].mxu1 %vm185_vm2, %v443_v21 }
 0x672   :  { %1974 = vmatpush3.xpose.msk.msra.mxu1 %vm185_vm2, %v529_v18  ;;  %1975 = vmatprep.mubr.msk.f32.mxu1 %vm2118_vm0, %v2117_v0 }
 0x673   :  { %1978 = vmatprep.subr.mxu1 %v2117_v0 }
 0x675   :  { %1976 = vmatmul.mubr.msk.f32.vlgmr.msra.gmra.mrb[12].mxu1 %vm185_vm2, %v527_v22 }
 0x676   :  { %1980 = vmatprep.mubr.msk.f32.mxu1 %vm2118_vm0, %v2117_v0 }
 0x744   :  { %v2360_v23 = vpop.f32.mrb[10].mxu1 }
 0x745   :  { %v1972_v24 = vpop.f32.mrb[11].mxu1 }
 0x748   :  { %v600_v25 = vpop.f32.mrb[12].mxu1 }
 0x749   :  { %v604_v27 = vmul.f32 0.35355338, %v600_v25  ;;  %v1977_v28 = vpop.f32.mrb[13].mxu1 }
 0x74b   :  { %v607_v29 = vadd.f32 %v1837_v26, %v604_v27 }
 0x74d   :  { %v608_v30 = vsel %vm185_vm2, %v607_v29, -inf }
 0x74e   :  { %609 = vmax.xlane.f32.xlu1 %v608_v30 }
 0x75f   :  { %619 = vrot.lane.b32.xlu1 %v2307_v44, %s2126_s0 }
 0x763   :  { %703 = vrot.lane.b32.xlu1 %v2307_v44, %s2127_s20 }
 0x767   :  { %701 = vrot.lane.b32.xlu1 %v2307_v44, %s2128_s21 }
 0x76b   :  { %877 = vrot.lane.b32.xlu1 %v2309_v47, %s2120_s26 }
 0x76f   :  { %1047 = vrot.lane.b32.xlu1 %v2309_v47, %s2121_s27 }
 0x773   :  { %1221 = vrot.lane.b32.xlu1 %v2309_v47, %s2123_s30 }
 0x777   :  { %1219 = vrot.lane.b32.xlu1 %v2309_v47, %s2125_s17 }
 0x77b   :  { %1395 = vrot.lane.b32.xlu1 %v2309_v47, %s2127_s20 }
 0x77f   :  { %1393 = vrot.lane.b32.xlu1 %v2309_v47, %s2128_s21 }
 0x7db   :  { %v610_v31 = vpop.xlane.xlu1 %609 }
 0x7dc   :  { %v611_v32 = vsub.f32 %v607_v29, %v610_v31 }
 0x7de   :  { %v612_v33 = vmul.f32 1.442695, %v611_v32 }
 0x7df   :  { %v620_v34 = vpop.permute.xlu1 %619 }
 0x7e0   :  { %2093 = vpow2.f32 %v612_v33  ;;  %1979 = vmatpush3.msra.mxu1 %v620_v34 }
 0x7e1   :  { %1983 = vmatprep.subr.mxu1 %v2117_v0 }
 0x7e3   :  { %v704_v35 = vpop.permute.xlu1 %703 }
 0x7e7   :  { %v702_v36 = vpop.permute.xlu1 %701 }
 0x7ea   :  { %v2094_v37 = vpop.eup %2093 }
 0x7eb   :  { %v878_v40 = vpop.permute.xlu1 %877  ;;  %v614_v41 = vsel %vm185_vm2, %v2094_v37, 0.0 }
 0x7ec   :  { %615 = vadd.xlane.f32.xlu0 %v614_v41  ;;  %1994 = vmatpush3.xpose.msk.msra.mxu0 %vm185_vm2, %v878_v40 }
 0x7ed   :  { %2003 = vmatprep.subr.mxu0 %v2117_v0 }
 0x7ef   :  { %1996 = vmatmul.mubr.msk.f32.vlgmr.msra.gmra.mrb[4].mxu0 %vm185_vm2, %v2309_v47  ;;  %v1048_v42 = vpop.permute.xlu1 %1047 }
 0x7f0   :  { %2004 = vmatpush3.xpose.msk.msra.mxu0 %vm185_vm2, %v1048_v42  ;;  %2005 = vmatprep.mubr.msk.f32.mxu0 %vm2118_vm0, %v2117_v0 }
 0x7f1   :  { %2013 = vmatprep.subr.mxu0 %v2117_v0 }
 0x7f3   :  { %v1222_v43 = vpop.permute.xlu1 %1221 }
 0x7f7   :  { %v1220_v45 = vpop.permute.xlu1 %1219 }
 0x7fb   :  { %v1396_v49 = vpop.permute.xlu1 %1395 }
 0x7ff   :  { %v1394_v51 = vpop.permute.xlu1 %1393 }
 0x802   :  { %1045 = vrot.lane.b32.xlu0 %v2309_v47, %s2124_s15  ;;  %s2130_s15 = smov 8  }
 0x879   :  { %v616_v46 = vpop.xlane.xlu0 %615 }
 0x87a   :  { %2095 = vrcp.f32 %v616_v46 }
 0x87d   :  { %v1046_v48 = vpop.permute.xlu0 %1045 }
 0x87e   :  { %2006 = vmatmul.mubr.msk.f32.vlgmr.msra.gmra.mrb[6].mxu0 %vm185_vm2, %v1046_v48 }
 0x87f   :  { %2014 = vmatpush3.xpose.msk.msra.mxu0 %vm185_vm2, %v1222_v43  ;;  %2015 = vmatprep.mubr.msk.f32.mxu0 %vm2118_vm0, %v2117_v0 }
 0x880   :  { %2023 = vmatprep.subr.mxu0 %v2117_v0 }
 0x882   :  { %2016 = vmatmul.mubr.msk.f32.vlgmr.msra.gmra.mrb[8].mxu0 %vm185_vm2, %v1220_v45 }
 0x883   :  { %2024 = vmatpush3.xpose.msk.msra.mxu0 %vm185_vm2, %v1396_v49  ;;  %2025 = vmatprep.mubr.msk.f32.mxu0 %vm2118_vm0, %v2117_v0 }
 0x884   :  { %v2096_v50 = vpop.eup %2095  ;;  %2033 = vmatprep.subr.bf16.mxu0 %v2117_v0 }
 0x885   :  { %v618_v52 = vmul.f32 %v2096_v50, %v2094_v37 }
 0x886   :  { %2026 = vmatmul.mubr.msk.f32.vlgmr.msra.gmra.mrb[10].mxu0 %vm185_vm2, %v1394_v51 }
 0x887   :  { %1981 = vmatmul.mubr.msk.f32.vlgmr.msra.gmra.mrb[14].mxu1 %vm185_vm2, %v618_v52  ;;  %2037 = vmatprep.mubr.msk.bf16.mxu0 %vm2118_vm0, %v2117_v0 }
 0x888   :  { %1984 = vmatpush3.xpose.msk.msra.mxu1 %vm185_vm2, %v704_v35  ;;  %1985 = vmatprep.mubr.msk.f32.mxu1 %vm2118_vm0, %v2117_v0 }
 0x889   :  { %1988 = vmatprep.subr.mxu1 %v2117_v0 }
 0x88b   :  { %1986 = vmatmul.mubr.msk.f32.vlgmr.msra.gmra.mrb[16].mxu1 %vm185_vm2, %v702_v36 }
 0x88c   :  { %1990 = vmatprep.mubr.msk.f32.mxu1 %vm2118_vm0, %v2117_v0 }
 0x8c2   :  { %v949_v53 = vpop.f32.mrb[4].mxu0 }
 0x8c3   :  { %v953_v55 = vmul.f32 0.35355338, %v949_v53  ;;  %v1997_v56 = vpop.f32.mrb[5].mxu0 }
 0x8c5   :  { %v956_v57 = vadd.f32 %v1845_v54, %v953_v55 }
 0x8c7   :  { %v957_v58 = vsel %vm185_vm2, %v956_v57, -inf }
 0x8c8   :  { %958 = vmax.xlane.f32.xlu0 %v957_v58 }
 0x951   :  { %v1119_v59 = vpop.f32.mrb[6].mxu0 }
 0x952   :  { %v1123_v61 = vmul.f32 0.35355338, %v1119_v59  ;;  %v2007_v62 = vpop.f32.mrb[7].mxu0 }
 0x954   :  { %v1126_v63 = vadd.f32 %v1849_v60, %v1123_v61 }
 0x955   :  { %v959_v1 = vpop.xlane.xlu0 %958  ;;  %v1293_v2 = vpop.f32.mrb[8].mxu0 }
 0x956   :  { %v960_v3 = vsub.f32 %v956_v57, %v959_v1  ;;  %v2017_v4 = vpop.f32.mrb[9].mxu0  ;;  %v1127_v5 = vsel %vm185_vm2, %v1126_v63, -inf  ;;  %v1297_v17 = vmul.f32 0.35355338, %v1293_v2 }
 0x957   :  { %1128 = vmax.xlane.f32.xlu0 %v1127_v5 }
 0x958   :  { %v961_v6 = vmul.f32 1.442695, %v960_v3  ;;  %v1300_v24 = vadd.f32 %v1853_v20, %v1297_v17 }
 0x959   :  { %v1467_v7 = vpop.f32.mrb[10].mxu0 }
 0x95a   :  { %2097 = vpow2.f32 %v961_v6  ;;  %v1471_v9 = vmul.f32 0.35355338, %v1467_v7  ;;  %v691_v10 = vpop.f32.mrb[14].mxu1  ;;  %v2027_v11 = vpop.f32.mrb[11].mxu0  ;;  %v1301_v27 = vsel %vm185_vm2, %v1300_v24, -inf }
 0x95b   :  { %v1982_v12 = vpop.f32.mrb[15].mxu1 }
 0x95c   :  { %v1474_v13 = vadd.f32 %v1857_v8, %v1471_v9  ;;  %v1569_v12 = vld [vmem:[%s2589_s6] sm:$0xff] }
 0x95e   :  { %v775_v14 = vpop.f32.mrb[16].mxu1  ;;  %v1475_v15 = vsel %vm185_vm2, %v1474_v13, -inf }
 0x95f   :  { %v779_v18 = vmul.f32 0.35355338, %v775_v14  ;;  %v1987_v19 = vpop.f32.mrb[17].mxu1  ;;  %1476 = vmax.xlane.f32.xlu0 %v1475_v15  ;;  %v1571_v14 = vld [vmem:[%s2589_s6 + $0x10] sm:$0xff] }
 0x961   :  { %v782_v21 = vadd.f32 %v1841_v16, %v779_v18  ;;  %v1572_v16 = vld [vmem:[%s2589_s6 + $0x18] sm:$0xff] }
 0x962   :  { %v1575_v18 = vpack.c.bf16 %v1572_v16, %v1571_v14 }
 0x963   :  { %v783_v22 = vsel %vm185_vm2, %v782_v21, -inf }
 0x964   :  { %v2432_v25 = vpop.eup %2097  ;;  %784 = vmax.xlane.f32.xlu1 %v783_v22 }
 0x965   :  { %v963_v26 = vsel %vm185_vm2, %v2432_v25, 0.0 }
 0x966   :  { %964 = vadd.xlane.f32.xlu0 %v963_v26 }
 0x968   :  { %1302 = vmax.xlane.f32.xlu1 %v1301_v27 }
 0x9e4   :  { %v1129_v28 = vpop.xlane.xlu0 %1128 }
 0x9e5   :  { %v1130_v29 = vsub.f32 %v1126_v63, %v1129_v28 }
 0x9e7   :  { %v1131_v30 = vmul.f32 1.442695, %v1130_v29 }
 0x9e9   :  { %2099 = vpow2.f32 %v1131_v30 }
 0x9ec   :  { %v1477_v31 = vpop.xlane.xlu0 %1476 }
 0x9ed   :  { %v1478_v32 = vsub.f32 %v1474_v13, %v1477_v31  ;;  %v1570_v13 = vld [vmem:[%s2589_s6 + $0x8] sm:$0xff] }
 0x9ee   :  { %v1574_v15 = vpack.c.bf16 %v1570_v13, %v1569_v12 }
 0x9ef   :  { %v1479_v33 = vmul.f32 1.442695, %v1478_v32  ;;  %v1631_v32 = vld [vmem:[%s2590_s8] sm:$0xff] }
 0x9f0   :  { %2034 = vmatpush3.bf16.msra.mxu0 %v1574_v15  ;;  %v1864_v15 = vld [vmem:[%s2595_s11] ss:$0 sm:$0xff] }
 0x9f1   :  { %2101 = vpow2.f32 %v1479_v33  ;;  %v785_v34 = vpop.xlane.xlu1 %784  ;;  %2035 = vmatprep.subr.bf16.mxu0 %v2117_v0  ;;  %v1632_v33 = vld [vmem:[%s2590_s8 + $0x8] sm:$0xff] }
 0x9f2   :  { %v786_v48 = vsub.f32 %v782_v21, %v785_v34  ;;  %v1636_v34 = vpack.c.bf16 %v1632_v33, %v1631_v32 }
 0x9f3   :  { %v2437_v35 = vpop.eup %2099 }
 0x9f4   :  { %v1133_v36 = vsel %vm185_vm2, %v2437_v35, 0.0  ;;  %v787_v49 = vmul.f32 1.442695, %v786_v48  ;;  %2036 = vmatpush3.bf16.msra.mxu0 %v1575_v18 }
 0x9f5   :  { %1134 = vadd.xlane.f32.xlu1 %v1133_v36  ;;  %v1303_v37 = vpop.xlane.xlu1 %1302  ;;  %2049 = vmatprep.subr.bf16.mxu0 %v2117_v0  ;;  %v1634_v36 = vld [vmem:[%s2590_s8 + $0x18] sm:$0xff] }
 0x9f6   :  { %v1304_v40 = vsub.f32 %v1300_v24, %v1303_v37 }
 0x9f8   :  { %v1305_v41 = vmul.f32 1.442695, %v1304_v40  ;;  %v1691_v40 = vld [vmem:[%s2591_s10] sm:$0xff] }
 0x9fa   :  { %2103 = vpow2.f32 %v1305_v41  ;;  %v1692_v41 = vld [vmem:[%s2591_s10 + $0x8] sm:$0xff] }
 0x9fb   :  { %v2441_v42 = vpop.eup %2101  ;;  %2105 = vpow2.f32 %v787_v49 }
 0x9fc   :  { %v1481_v43 = vsel %vm185_vm2, %v2441_v42, 0.0 }
 0x9fd   :  { %1482 = vadd.xlane.f32.xlu1 %v1481_v43  ;;  %v1700_v43 = vpack.c.bf16 %v1692_v41, %v1691_v40 }
 0xa04   :  { %v2104_v45 = vpop.eup %2103 }
 0xa05   :  { %v1307_v46 = vsel %vm185_vm2, %v2104_v45, 0.0  ;;  %v2106_v50 = vpop.eup %2105 }
 0xa06   :  { %1308 = vadd.xlane.f32.xlu0 %v1307_v46  ;;  %v789_v51 = vsel %vm185_vm2, %v2106_v50, 0.0 }
 0xa0e   :  { %968 = vrot.lane.b32.xlu1 %v2309_v47, %s2119_s3  ;;  %s2132_s3 = smov 24  }
 0xa1c   :  { %794 = vrot.lane.b32.xlu0 %v2307_v44, %s2129_s1  ;;  %v965_v44 = vpop.xlane.xlu0 %964 }
 0xa20   :  { %1312 = vrot.lane.b32.xlu0 %v2309_v47, %s2126_s0 }
 0xa24   :  { %521 = vrot.lane.b32.xlu0 %v2360_v23, %s2130_s15 }
 0xa28   :  { %696 = vrot.lane.b32.xlu0 %v691_v10, %s2131_s16 }
 0xa32   :  { %790 = vadd.xlane.f32.xlu1 %v789_v51  ;;  %v1860_v51 = vld [vmem:[%s2592_s7] ss:$0 sm:$0xff] }
 0xa43   :  { %1138 = vrot.lane.b32.xlu1 %v2309_v47, %s2122_s29 }
 0xa47   :  { %1486 = vrot.lane.b32.xlu1 %v2309_v47, %s2129_s1 }
 0xa82   :  { %v1135_v56 = vpop.xlane.xlu1 %1134 }
 0xa8a   :  { %v1483_v57 = vpop.xlane.xlu1 %1482 }
 0xa8e   :  { %v969_v58 = vpop.permute.xlu1 %968 }
 0xa93   :  { %v1309_v52 = vpop.xlane.xlu0 %1308 }
 0xa97   :  { %v795_v53 = vpop.permute.xlu0 %794 }
 0xa98   :  { %1989 = vmatpush3.msra.mxu1 %v795_v53 }
 0xa99   :  { %1998 = vmatprep.subr.mxu1 %v2117_v0 }
 0xa9b   :  { %v1313_v54 = vpop.permute.xlu0 %1312 }
 0xa9f   :  { %v522_v23 = vpop.permute.xlu0 %521 }
 0xaa0   :  { %525 = vst.msk [vmem:[#allocation2] sm:$0xff] %vm524_vm3, %v522_v23 }
 0xaa3   :  { %v697_v55 = vpop.permute.xlu0 %696 }
 0xaa4   :  { %700 = vst.msk [vmem:[#allocation2] sm:$0xff] %vm699_vm4, %v697_v55 }
 0xabf   :  { %v791_v59 = vpop.xlane.xlu1 %790 }
 0xac0   :  { %2107 = vrcp.f32 %v791_v59 }
 0xac1   :  { %2109 = vrcp.f32 %v965_v44 }
 0xac2   :  { %2111 = vrcp.f32 %v1135_v56  ;;  %v1696_v56 = vld [vmem:[%s2591_s10 + $0x28] sm:$0xff] }
 0xac3   :  { %2113 = vrcp.f32 %v1309_v52  ;;  %v1139_v1 = vpop.permute.xlu1 %1138 }
 0xac4   :  { %2115 = vrcp.f32 %v1483_v57 }
 0xac7   :  { %v1487_v6 = vpop.permute.xlu1 %1486 }
 0xaca   :  { %v2108_v47 = vpop.eup %2107 }
 0xacb   :  { %v793_v60 = vmul.f32 %v2108_v47, %v2106_v50  ;;  %v2110_v61 = vpop.eup %2109  ;;  %v1861_v47 = vld [vmem:[%s2593_s9] ss:$0 sm:$0xff] }
 0xacc   :  { %v967_v62 = vmul.f32 %v2110_v61, %v2432_v25  ;;  %v2112_v63 = vpop.eup %2111 }
 0xacd   :  { %1991 = vmatmul.mubr.msk.f32.vlgmr.msra.gmra.mrb[18].mxu1 %vm185_vm2, %v793_v60  ;;  %v1137_v2 = vmul.f32 %v2112_v63, %v2437_v35  ;;  %v2114_v3 = vpop.eup %2113  ;;  %v1633_v35 = vld [vmem:[%s2590_s8 + $0x10] sm:$0xff] }
 0xace   :  { %1999 = vmatpush3.msra.mxu1 %v969_v58  ;;  %2000 = vmatprep.mubr.msk.f32.mxu1 %vm2118_vm0, %v2117_v0  ;;  %v1311_v4 = vmul.f32 %v2114_v3, %v2104_v45  ;;  %v2116_v5 = vpop.eup %2115  ;;  %v1637_v37 = vpack.c.bf16 %v1634_v36, %v1633_v35  ;;  %v1694_v45 = vld [vmem:[%s2591_s10 + $0x18] sm:$0xff] }
 0xacf   :  { %2008 = vmatprep.subr.mxu1 %v2117_v0  ;;  %v1485_v7 = vmul.f32 %v2116_v5, %v2441_v42  ;;  %v1693_v42 = vld [vmem:[%s2591_s10 + $0x10] sm:$0xff]  ;;  %v1698_v58 = vld [vmem:[%s2591_s10 + $0x38] sm:$0xff] }
 0xad0   :  { %v1701_v46 = vpack.c.bf16 %v1694_v45, %v1693_v42 }
 0xad1   :  { %2001 = vmatmul.mubr.msk.f32.vlgmr.msra.gmra.mrb[20].mxu1 %vm185_vm2, %v967_v62 }
 0xad2   :  { %2009 = vmatpush3.msra.mxu1 %v1139_v1  ;;  %2010 = vmatprep.mubr.msk.f32.mxu1 %vm2118_vm0, %v2117_v0 }
 0xad3   :  { %2018 = vmatprep.subr.mxu1 %v2117_v0 }
 0xad5   :  { %2011 = vmatmul.mubr.msk.f32.vlgmr.msra.gmra.mrb[22].mxu1 %vm185_vm2, %v1137_v2 }
 0xad6   :  { %2019 = vmatpush3.msra.mxu1 %v1313_v54  ;;  %2020 = vmatprep.mubr.msk.f32.mxu1 %vm2118_vm0, %v2117_v0 }
 0xad7   :  { %2028 = vmatprep.subr.mxu1 %v2117_v0 }
 0xad9   :  { %2021 = vmatmul.mubr.msk.f32.vlgmr.msra.gmra.mrb[24].mxu1 %vm185_vm2, %v1311_v4 }
 0xada   :  { %2029 = vmatpush3.msra.mxu1 %v1487_v6  ;;  %2030 = vmatprep.mubr.msk.f32.mxu1 %vm2118_vm0, %v2117_v0  ;;  %v1760_v6 = vld [vmem:[%s2594_s12] sm:$0xff] }
 0xadb   :  { %2041 = vmatprep.subr.bf16.mxu1 %v2117_v0 }
 0xadd   :  { %2031 = vmatmul.mubr.msk.f32.vlgmr.msra.gmra.mrb[26].mxu1 %vm185_vm2, %v1485_v7  ;;  %v1761_v7 = vld [vmem:[%s2594_s12 + $0x8] sm:$0xff] }
 0xade   :  { %2045 = vmatprep.mubr.msk.bf16.mxu1 %vm2118_vm0, %v2117_v0  ;;  %2042 = vmatpush3.bf16.msra.mxu1 %v1636_v34 }
 0xadf   :  { %2043 = vmatprep.subr.bf16.mxu1 %v2117_v0 }
 0xae2   :  { %2044 = vmatpush3.bf16.msra.mxu1 %v1637_v37 }
 0xae3   :  { %2061 = vmatprep.subr.bf16.mxu1 %v2117_v0 }
 0xba0   :  { %v866_v8 = vpop.f32.mrb[18].mxu1 }
 0xba1   :  { %871 = vrot.lane.b32.xlu0 %v866_v8, %s2132_s3  ;;  %v1992_v9 = vpop.f32.mrb[19].mxu1  ;;  %v1765_v8 = vpack.c.bf16 %v1761_v7, %v1760_v6 }
 0xba2   :  { %v1762_v9 = vld [vmem:[%s2594_s12 + $0x10] sm:$0xff] }
 0xba4   :  { %v1040_v10 = vpop.f32.mrb[20].mxu1 }
 0xba5   :  { %1044 = vst.msk [vmem:[#allocation2 + $0x8] sm:$0xff] %vm185_vm2, %v1040_v10  ;;  %v2002_v11 = vpop.f32.mrb[21].mxu1  ;;  %v1763_v10 = vld [vmem:[%s2594_s12 + $0x18] sm:$0xff] }
 0xba6   :  { %v1766_v11 = vpack.c.bf16 %v1763_v10, %v1762_v9 }
 0xba8   :  { %v1210_v17 = vpop.f32.mrb[22].mxu1 }
 0xba9   :  { %1215 = vrot.lane.b32.xlu1 %v1210_v17, %s2130_s15  ;;  %v2012_v19 = vpop.f32.mrb[23].mxu1 }
 0xbac   :  { %v1384_v20 = vpop.f32.mrb[24].mxu1 }
 0xbad   :  { %1389 = vrot.lane.b32.xlu1 %v1384_v20, %s2131_s16  ;;  %v2022_v21 = vpop.f32.mrb[25].mxu1 }
 0xbae   :  { %v1865_v21 = vld [vmem:[%s2596_s13] ss:$0 sm:$0xff] }
 0xbb0   :  { %v1558_v22 = vpop.f32.mrb[26].mxu1 }
 0xbb1   :  { %1563 = vrot.lane.b32.xlu1 %v1558_v22, %s2132_s3  ;;  %v2032_v24 = vpop.f32.mrb[27].mxu1 }
 0xc13   :  { %v872_v25 = vpop.permute.xlu0 %871 }
 0xc14   :  { %875 = vst.msk [vmem:[#allocation2] sm:$0xff] %vm874_vm5, %v872_v25 }
 0xc1b   :  { %v1216_v26 = vpop.permute.xlu1 %1215  ;;  %v1567_v29 = vld [vmem:[#allocation2] sm:$0xff] }
 0xc1c   :  { %1218 = vst.msk [vmem:[#allocation2 + $0x8] sm:$0xff] %vm524_vm3, %v1216_v26 }
 0xc1f   :  { %v1390_v27 = vpop.permute.xlu1 %1389 }
 0xc20   :  { %1392 = vst.msk [vmem:[#allocation2 + $0x8] sm:$0xff] %vm699_vm4, %v1390_v27 }
 0xc23   :  { %v1564_v28 = vpop.permute.xlu1 %1563 }
 0xc24   :  { %1566 = vst.msk [vmem:[#allocation2 + $0x8] sm:$0xff] %vm874_vm5, %v1564_v28 }
 0xc2b   :  { %v1568_v30 = vld [vmem:[#allocation2 + $0x8] sm:$0xff] }
 0xc2c   :  { %v1573_v31 = vpack.c.bf16 %v1568_v30, %v1567_v29 }
 0xc2e   :  { %2038 = vmatmul.mubr.msk.bf16.vlgmr.msra.gmra.mrb[12].mxu0 %vm137_vm1, %v1573_v31 }
 0xc2f   :  { %2057 = vmatprep.mubr.msk.bf16.mxu0 %vm2118_vm0, %v2117_v0  ;;  %2050 = vmatpush3.bf16.msra.mxu0 %v1700_v43 }
 0xc30   :  { %2051 = vmatprep.subr.bf16.mxu0 %v2117_v0 }
 0xc33   :  { %2052 = vmatpush3.bf16.msra.mxu0 %v1701_v46 }
 0xc34   :  { %2053 = vmatprep.subr.bf16.mxu0 %v2117_v0 }
 0xd01   :  { %v1613_v48 = vpop.f32.mrb[12].mxu0 }
 0xd02   :  { %v1620_v49 = vadd.f32 %v1613_v48, %v2295_v38  ;;  %v2039_v50 = vpop.f32.mrb[13].mxu0  ;;  %v1695_v38 = vld [vmem:[%s2591_s10 + $0x20] sm:$0xff] }
 0xd03   :  { %v1616_v44 = vpop.f32.mrb[14].mxu0  ;;  %v1702_v57 = vpack.c.bf16 %v1696_v56, %v1695_v38 }
 0xd04   :  { %v1621_v52 = vadd.f32 %v1616_v44, %v2297_v39  ;;  %v2040_v53 = vpop.f32.mrb[15].mxu0  ;;  %v1629_v54 = vadd.f32 %v1860_v51, %v1620_v49  ;;  %v1697_v39 = vld [vmem:[%s2591_s10 + $0x30] sm:$0xff] }
 0xd05   :  { %2054 = vmatpush3.bf16.msra.mxu0 %v1702_v57  ;;  %v1703_v59 = vpack.c.bf16 %v1698_v58, %v1697_v39 }
 0xd06   :  { %v1630_v23 = vadd.f32 %v1860_v51, %v1621_v52  ;;  %2055 = vmatprep.subr.bf16.mxu0 %v2117_v0 }
 0xd08   :  { %v1635_v55 = vpack.c.bf16 %v1630_v23, %v1629_v54 }
 0xd09   :  { %2056 = vmatpush3.bf16.msra.mxu0 %v1703_v59 }
 0xd0a   :  { %2046 = vmatmul.mubr.msk.bf16.vlgmr.msra.gmra.mrb[28].mxu1 %vm137_vm1, %v1635_v55 }
 0xd0b   :  { %2065 = vmatprep.mubr.msk.bf16.mxu1 %vm2118_vm0, %v2117_v0  ;;  %2062 = vmatpush3.bf16.msra.mxu1 %v1765_v8 }
 0xd0c   :  { %2063 = vmatprep.subr.bf16.mxu1 %v2117_v0 }
 0xd0f   :  { %2064 = vmatpush3.bf16.msra.mxu1 %v1766_v11 }
 0xddd   :  { %v1682_v60 = vpop.f32.mrb[28].mxu1 }
 0xdde   :  { %v1683_v61 = vadd.f32 %v1861_v47, %v1682_v60  ;;  %v2047_v62 = vpop.f32.mrb[29].mxu1 }
 0xddf   :  { %v1685_v63 = vpop.f32.mrb[30].mxu1 }
 0xde0   :  { %v1686_v1 = vadd.f32 %v1861_v47, %v1685_v63  ;;  %v2048_v2 = vpop.f32.mrb[31].mxu1  ;;  %v1689_v3 = vmax.f32 %v1683_v61, 0.0 }
 0xde2   :  { %v1690_v4 = vmax.f32 %v1686_v1, 0.0 }
 0xde4   :  { %v1699_v5 = vpack.c.bf16 %v1690_v4, %v1689_v3 }
 0xde6   :  { %2058 = vmatmul.mubr.msk.bf16.vlgmr.msra.gmra.mrb[16].mxu0 %vm1704_vm6, %v1699_v5 }
 0xeb9   :  { %v1742_v12 = vpop.f32.mrb[16].mxu0 }
 0xeba   :  { %v1749_v13 = vadd.f32 %v1742_v12, %v1629_v54  ;;  %v2059_v14 = vpop.f32.mrb[17].mxu0 }
 0xebb   :  { %v1745_v16 = vpop.f32.mrb[18].mxu0 }
 0xebc   :  { %v1750_v17 = vadd.f32 %v1745_v16, %v1630_v23  ;;  %v2060_v0 = vpop.f32.mrb[19].mxu0  ;;  %v1758_v18 = vadd.f32 %v1864_v15, %v1749_v13 }
 0xebe   :  { %v1759_v19 = vadd.f32 %v1864_v15, %v1750_v17 }
 0xec0   :  { %v1764_v20 = vpack.c.bf16 %v1759_v19, %v1758_v18 }
 0xec2   :  { %2066 = vmatmul.mubr.msk.bf16.vlgmr.msra.gmra.mrb[32].mxu1 %vm137_vm1, %v1764_v20 }
 0xf95   :  { %v1811_v22 = vpop.f32.mrb[32].mxu1 }
 0xf96   :  { %v1812_v24 = vadd.f32 %v1865_v21, %v1811_v22  ;;  %v2067_v25 = vpop.f32.mrb[33].mxu1 }
 0xf97   :  { %v1814_v26 = vpop.f32.mrb[34].mxu1 }
 0xf98   :  { %1819 = vst.msk [vmem:[%s2597_s14] sm:$0xff] %vm1818_vm7, %v1812_v24  ;;  %v1815_v27 = vadd.f32 %v1865_v21, %v1814_v26  ;;  %v2068_v28 = vpop.f32.mrb[35].mxu1 }
 0xf9a   :  { %1820 = vst.msk [vmem:[%s2597_s14 + $0x8] sm:$0xff] %vm1818_vm7, %v1815_v27 }

</bundles_post_ra>
